<compile_context>
chip_gen: v7x
topology: tpu7x:2x2x1
jax: 0.10.0
libtpu: 0.0.40
codegen_flags: <defaults>
</compile_context>

<pallas_src>
import jax
import jax.numpy as jnp
from jax.experimental import pallas as pl
from jax.experimental.pallas import tpu as pltpu


# ----------------------------------------------------------------------------
# Fused Pallas kernel: conv1 -> conv2 -> Linear x4 (ReLU after all but last)
# ----------------------------------------------------------------------------
def _fused_forward_kernel(x_ref,              # (TB*64, 36) bf16  conv1 im2col
                          w1_ref, b1_ref,     # (36, 8) bf16, (1, 8) f32
                          g_ref,              # (144, 64) bf16  conv2 gather
                          w2_ref, b2_ref,     # (72, 16) bf16, (1, 16) f32
                          w0_ref, b0_ref,     # (256, 128) bf16, (1, 128) f32
                          wf1_ref, bf1_ref,   # (128, 128) bf16, (1, 128) f32
                          wf2_ref, bf2_ref,   # (128, 128) bf16, (1, 128) f32
                          wf3_ref, bf3_ref,   # (128, 128) bf16, (1, 128) f32
                          o_ref,              # (TB, 128) f32
                          feat_ref):          # VMEM scratch (TB, 256) bf16
    f32, bf16 = jnp.float32, jnp.bfloat16
    tb = o_ref.shape[0]

    # conv1 (4->8, 3x3, s2, p1): one im2col matmul over all TB*64 output pixels
    h1 = jnp.dot(x_ref[...], w1_ref[...], preferred_element_type=f32)
    h1 = jnp.maximum(h1 + b1_ref[...], 0.0).astype(bf16)          # (TB*64, 8)

    g = g_ref[...]
    w2 = w2_ref[...]
    b2 = b2_ref[...]

    # conv2 (8->16, 3x3, s2, p1): per-sample binary spatial gather (144x64)
    # followed by 9 per-tap (8->16) channel matmuls.  The flattened NHWC-style
    # features go straight into the VMEM scratch that feeds the MLP head.
    for b in range(tb):                                            # static unroll
        h1_b = h1[b * 64:(b + 1) * 64, :]                          # (64, 8)
        p_b = jnp.dot(g, h1_b, preferred_element_type=f32).astype(bf16)  # (144, 8)
        acc2 = jnp.zeros((16, 16), f32)
        for t in range(9):
            acc2 = acc2 + jnp.dot(p_b[t * 16:(t + 1) * 16, :],
                                  w2[t * 8:(t + 1) * 8, :],
                                  preferred_element_type=f32)
        h2 = jnp.maximum(acc2 + b2, 0.0).astype(bf16)              # (16, 16)
        for p in range(16):     # flatten: feature index = p*16 + channel
            feat_ref[b:b + 1, p * 16:(p + 1) * 16] = h2[p:p + 1, :]

    # classifier head: Linear -> ReLU -> Dropout (eval=identity), x3, + Linear
    # TODO(synk): training-mode dropout masking is not implemented.
    def dense(h, w_ref, b_ref, relu):
        y = jnp.dot(h, w_ref[...], preferred_element_type=f32) + b_ref[...]
        if relu:
            y = jnp.maximum(y, 0.0).astype(bf16)
        return y

    h = feat_ref[...]                                              # (TB, 256) bf16
    h = dense(h, w0_ref, b0_ref, relu=True)
    h = dense(h, wf1_ref, bf1_ref, relu=True)
    h = dense(h, wf2_ref, bf2_ref, relu=True)
    o_ref[...] = dense(h, wf3_ref, bf3_ref, relu=False).astype(o_ref.dtype)


# ----------------------------------------------------------------------------
# Wrapper: cheap im2col of the tiny input + batched, grid-parallel pallas_call
# ----------------------------------------------------------------------------
def _im2col_conv1(x):
    """(B, Cin, 16, 16) NCHW -> (B, 64, Cin*9) patches for a 3x3/s2/p1 conv.

    Row p = ho*8 + wo, column = ci*9 + kh*3 + kw (matches the (36, 8) weight).
    """
    B, C, H, W = x.shape
    ho, wo = H // 2, W // 2
    xp = jnp.pad(x, ((0, 0), (0, 0), (1, 1), (1, 1)))
    taps = []
    for kh in range(3):
        for kw in range(3):
            taps.append(xp[:, :, kh:kh + H:2, kw:kw + W:2])        # (B, C, ho, wo)
    p = jnp.stack(taps, axis=2)                                    # (B, C, 9, ho, wo)
    return p.transpose(0, 3, 4, 1, 2).reshape(B, ho * wo, C * 9)


def conv_ae_classifier_forward(x, fused, *, tile_b=8, num_classes=4):
    """x: (B, 4, 16, 16) NCHW float32; `fused` from prepare_params()."""
    B = x.shape[0]
    tb = min(B, tile_b)
    nb = -(-B // tb)                     # ceil-div (static)
    b_pad = nb * tb

    x1 = _im2col_conv1(x.astype(jnp.float32))                      # (B, 64, 36)
    if b_pad != B:
        x1 = jnp.pad(x1, ((0, b_pad - B), (0, 0), (0, 0)))
    x1 = x1.reshape(b_pad * 64, 36).astype(jnp.bfloat16)

    operands = (x1,
                fused["w1m"], fused["b1"], fused["g2"],
                fused["w2m"], fused["b2"],
                fused["w0"], fused["b0"],
                fused["wf1"], fused["bf1"],
                fused["wf2"], fused["bf2"],
                fused["wf3"], fused["bf3"])

    def const_spec(a):                   # whole-array block, resident over grid
        return pl.BlockSpec(a.shape, lambda i, _n=a.ndim: (0,) * _n)

    in_specs = [pl.BlockSpec((tb * 64, 36), lambda i: (i, 0))]
    in_specs += [const_spec(a) for a in operands[1:]]
    out_specs = pl.BlockSpec((tb, 128), lambda i: (i, 0))

    flops = 2 * b_pad * (64 * 36 * 8 + 144 * 64 * 8 + 9 * 16 * 8 * 16
                         + 256 * 128 + 3 * 128 * 128)
    bytes_accessed = (sum(int(a.size) * a.dtype.itemsize for a in operands)
                      + b_pad * 128 * 4)

    out = pl.pallas_call(
        _fused_forward_kernel,
        grid=(nb,),
        in_specs=in_specs,
        out_specs=out_specs,
        out_shape=jax.ShapeDtypeStruct((b_pad, 128), jnp.float32),
        scratch_shapes=[pltpu.VMEM((tb, 256), jnp.bfloat16)],
        compiler_params=pltpu.CompilerParams(
            dimension_semantics=("parallel",)),
        cost_estimate=pl.CostEstimate(flops=flops, transcendentals=0,
                                      bytes_accessed=bytes_accessed),
    )(*operands)
    return out[:B, :num_classes]


# ----------------------------------------------------------------------------
# One-time parameter preparation (layout changes + bf16 cast hoisted off the
# hot path; ships only the *real* weights, no structural-zero conv folds)
# ----------------------------------------------------------------------------
def _conv2_gather_matrix():
    """(144, 64) binary matrix: row (kh*3+kw)*16 + ho*4+wo selects conv1-output
    pixel (2*ho-1+kh, 2*wo-1+kw) of the 8x8 grid; an all-zero row is padding."""
    rows = []
    for kh in range(3):
        for kw in range(3):
            for ho in range(4):
                for wo in range(4):
                    ih, iw = 2 * ho - 1 + kh, 2 * wo - 1 + kw
                    row = [0.0] * 64
                    if 0 <= ih < 8 and 0 <= iw < 8:
                        row[ih * 8 + iw] = 1.0
                    rows.append(row)
    return jnp.array(rows, dtype=jnp.bfloat16)


def prepare_params(params):
    bf16, f32 = jnp.bfloat16, jnp.float32
    w1, b1 = params["w1"], params["b1"]            # (8,4,3,3) OIHW, (8,)
    w2, b2 = params["w2"], params["b2"]            # (16,8,3,3) OIHW, (16,)
    ff = params["ff"]

    w1m = w1.transpose(1, 2, 3, 0).reshape(36, 8).astype(bf16)     # (ci,kh,kw)->co
    w2m = w2.transpose(2, 3, 1, 0).reshape(72, 16).astype(bf16)    # (kh,kw,ci)->co

    # classifier L0: reorder input features from PyTorch's NCHW flatten
    # (c*16 + p) to the kernel's (p*16 + c) layout, transpose, pad to 128 lanes.
    w0_pt, b0_pt = ff[0]                            # (32, 256), (32,)
    perm = (jnp.arange(16)[None, :] * 16 + jnp.arange(16)[:, None]).reshape(-1)
    w0 = jnp.zeros((256, 128), f32).at[:, :32].set(w0_pt[:, perm].T).astype(bf16)
    b0 = jnp.zeros((1, 128), f32).at[0, :32].set(b0_pt)

    def pad_linear(w, b):                           # PyTorch (out,in) -> (128,128)
        o, i = w.shape
        wm = jnp.zeros((128, 128), f32).at[:i, :o].set(w.T).astype(bf16)
        bm = jnp.zeros((1, 128), f32).at[0, :o].set(b)
        return wm, bm

    wf1, bf1 = pad_linear(*ff[1])
    wf2, bf2 = pad_linear(*ff[2])
    wf3, bf3 = pad_linear(*ff[3])

    return dict(w1m=w1m, b1=b1.reshape(1, 8).astype(f32),
                g2=_conv2_gather_matrix(),
                w2m=w2m, b2=b2.reshape(1, 16).astype(f32),
                w0=w0, b0=b0, wf1=wf1, bf1=bf1,
                wf2=wf2, bf2=bf2, wf3=wf3, bf3=bf3)


# ----------------------------------------------------------------------------
# Pure-JAX f32 reference (lax.conv) for the correctness check
# ----------------------------------------------------------------------------
def reference_forward(x, params):
    def conv(x, w, b):
        y = jax.lax.conv_general_dilated(
            x, w, window_strides=(2, 2), padding=((1, 1), (1, 1)),
            dimension_numbers=("NCHW", "OIHW", "NCHW"))
        return jax.nn.relu(y + b[None, :, None, None])

    h = conv(x, params["w1"], params["b1"])
    h = conv(h, params["w2"], params["b2"])
    h = h.reshape(h.shape[0], -1)
    for (w, b) in params["ff"][:-1]:
        h = jax.nn.relu(h @ w.T + b)
    w, b = params["ff"][-1]
    return h @ w.T + b


# ----------------------------------------------------------------------------
# Deterministic parameter construction (PyTorch-style uniform(+-1/sqrt(fan_in)))
# ----------------------------------------------------------------------------
def make_params(key):
    def uinit(key, shape, fan_in):
        bound = 1.0 / jnp.sqrt(fan_in)
        return jax.random.uniform(key, shape, jnp.float32, -bound, bound)

    ks = jax.random.split(key, 12)
    params = {
        "w1": uinit(ks[0], (8, 4, 3, 3), 4 * 9),
        "b1": uinit(ks[1], (8,), 4 * 9),
        "w2": uinit(ks[2], (16, 8, 3, 3), 8 * 9),
        "b2": uinit(ks[3], (16,), 8 * 9),
    }
    dims = [256, 32, 32, 32, 4]   # input_dim, hidden_layers=[32,32,32], classes
    ff = []
    for li in range(4):
        fin, fout = dims[li], dims[li + 1]
        ff.append((uinit(ks[4 + 2 * li], (fout, fin), fin),
                   uinit(ks[5 + 2 * li], (fout,), fin)))
    params["ff"] = ff
    return params


if __name__ == "__main__":
    key = jax.random.PRNGKey(0)
    kx, kp = jax.random.split(key)
    x = jax.random.normal(kx, (2, 4, 16, 16), dtype=jnp.float32)   # NCHW
    params = make_params(kp)

    fused = prepare_params(params)            # one-time weight prep (host/XLA)
    fwd = jax.jit(conv_ae_classifier_forward)

    out = jax.block_until_ready(fwd(x, fused))

    # Reference: f32 math with bf16-rounded inputs/weights (the kernel computes
    # in bf16 with f32 accumulation, so compare against bf16-rounded params).
    rnd = lambda a: a.astype(jnp.bfloat16).astype(jnp.float32)
    params_r = jax.tree_util.tree_map(rnd, params)
    ref = jax.block_until_ready(reference_forward(rnd(x), params_r))

    assert out.shape == (2, 4), out.shape
    err = float(jnp.max(jnp.abs(out - ref)))
    assert jnp.allclose(out, ref, atol=3e-2, rtol=3e-2), f"max abs err {err}"
    print("KERNEL_OK")
</pallas_src>

<mosaic_0001>
module attributes {stable_mosaic.version = 11 : i64} {
  func.func @_fused_forward_kernel(%arg0: i32, %arg1: memref<128x36xbf16, #tpu.memory_space<vmem>>, %arg2: memref<36x8xbf16, #tpu.memory_space<vmem>>, %arg3: memref<1x8xf32, #tpu.memory_space<vmem>>, %arg4: memref<144x64xbf16, #tpu.memory_space<vmem>>, %arg5: memref<72x16xbf16, #tpu.memory_space<vmem>>, %arg6: memref<1x16xf32, #tpu.memory_space<vmem>>, %arg7: memref<256x128xbf16, #tpu.memory_space<vmem>>, %arg8: memref<1x128xf32, #tpu.memory_space<vmem>>, %arg9: memref<128x128xbf16, #tpu.memory_space<vmem>>, %arg10: memref<1x128xf32, #tpu.memory_space<vmem>>, %arg11: memref<128x128xbf16, #tpu.memory_space<vmem>>, %arg12: memref<1x128xf32, #tpu.memory_space<vmem>>, %arg13: memref<128x128xbf16, #tpu.memory_space<vmem>>, %arg14: memref<1x128xf32, #tpu.memory_space<vmem>>, %arg15: memref<2x128xf32, #tpu.memory_space<vmem>>, %arg16: memref<2x256xbf16, #tpu.memory_space<vmem>>) attributes {dimension_semantics = [#tpu.dimension_semantics<parallel>], iteration_bounds = array<i64: 1>, scalar_prefetch = 0 : i64, scratch_operands = 1 : i64, tpu.core_type = #tpu.core_type<tc>, window_params = [{transform_indices = @transform_0, window_bounds = array<i64: 128, 36>}, {pipeline_mode = #tpu.pipeline_mode<synchronous>, transform_indices = @transform_1, window_bounds = array<i64: 36, 8>}, {pipeline_mode = #tpu.pipeline_mode<synchronous>, transform_indices = @transform_2, window_bounds = array<i64: 1, 8>}, {pipeline_mode = #tpu.pipeline_mode<synchronous>, transform_indices = @transform_3, window_bounds = array<i64: 144, 64>}, {pipeline_mode = #tpu.pipeline_mode<synchronous>, transform_indices = @transform_4, window_bounds = array<i64: 72, 16>}, {pipeline_mode = #tpu.pipeline_mode<synchronous>, transform_indices = @transform_5, window_bounds = array<i64: 1, 16>}, {pipeline_mode = #tpu.pipeline_mode<synchronous>, transform_indices = @transform_6, window_bounds = array<i64: 256, 128>}, {pipeline_mode = #tpu.pipeline_mode<synchronous>, transform_indices = @transform_7, window_bounds = array<i64: 1, 128>}, {pipeline_mode = #tpu.pipeline_mode<synchronous>, transform_indices = @transform_8, window_bounds = array<i64: 128, 128>}, {pipeline_mode = #tpu.pipeline_mode<synchronous>, transform_indices = @transform_9, window_bounds = array<i64: 1, 128>}, {pipeline_mode = #tpu.pipeline_mode<synchronous>, transform_indices = @transform_10, window_bounds = array<i64: 128, 128>}, {pipeline_mode = #tpu.pipeline_mode<synchronous>, transform_indices = @transform_11, window_bounds = array<i64: 1, 128>}, {pipeline_mode = #tpu.pipeline_mode<synchronous>, transform_indices = @transform_12, window_bounds = array<i64: 128, 128>}, {pipeline_mode = #tpu.pipeline_mode<synchronous>, transform_indices = @transform_13, window_bounds = array<i64: 1, 128>}, {transform_indices = @transform_14, window_bounds = array<i64: 2, 128>}]} {
    %c0 = arith.constant 0 : index
    %c0_0 = arith.constant 0 : index
    %0 = vector.load %arg1[%c0, %c0_0] : memref<128x36xbf16, #tpu.memory_space<vmem>>, vector<128x36xbf16>
    %c0_1 = arith.constant 0 : index
    %c0_2 = arith.constant 0 : index
    %1 = vector.load %arg2[%c0_1, %c0_2] : memref<36x8xbf16, #tpu.memory_space<vmem>>, vector<36x8xbf16>
    %cst = arith.constant dense<0.000000e+00> : vector<128x8xf32>
    %2 = tpu.matmul %0, %1, %cst {dimension_numbers = #tpu.dot_dimension_numbers<[1], [0], [0], [1], [0, 0, 1, 1], [], []>} : vector<128x36xbf16>, vector<36x8xbf16>, vector<128x8xf32> -> vector<128x8xf32>
    %c0_3 = arith.constant 0 : index
    %c0_4 = arith.constant 0 : index
    %3 = vector.load %arg3[%c0_3, %c0_4] : memref<1x8xf32, #tpu.memory_space<vmem>>, vector<1x8xf32>
    %4 = vector.broadcast %3 : vector<1x8xf32> to vector<128x8xf32>
    %5 = arith.addf %2, %4 : vector<128x8xf32>
    %cst_5 = arith.constant 0.000000e+00 : f32
    %6 = vector.broadcast %cst_5 : f32 to vector<128x8xf32>
    %7 = arith.maximumf %5, %6 : vector<128x8xf32>
    %8 = arith.truncf %7 : vector<128x8xf32> to vector<128x8xbf16>
    %c0_6 = arith.constant 0 : index
    %c0_7 = arith.constant 0 : index
    %9 = vector.load %arg4[%c0_6, %c0_7] : memref<144x64xbf16, #tpu.memory_space<vmem>>, vector<144x64xbf16>
    %c0_8 = arith.constant 0 : index
    %c0_9 = arith.constant 0 : index
    %10 = vector.load %arg5[%c0_8, %c0_9] : memref<72x16xbf16, #tpu.memory_space<vmem>>, vector<72x16xbf16>
    %c0_10 = arith.constant 0 : index
    %c0_11 = arith.constant 0 : index
    %11 = vector.load %arg6[%c0_10, %c0_11] : memref<1x16xf32, #tpu.memory_space<vmem>>, vector<1x16xf32>
    %12 = vector.extract_strided_slice %8 {offsets = [0, 0], sizes = [64, 8], strides = [1, 1]} : vector<128x8xbf16> to vector<64x8xbf16>
    %cst_12 = arith.constant dense<0.000000e+00> : vector<144x8xf32>
    %13 = tpu.matmul %9, %12, %cst_12 {dimension_numbers = #tpu.dot_dimension_numbers<[1], [0], [0], [1], [0, 0, 1, 1], [], []>} : vector<144x64xbf16>, vector<64x8xbf16>, vector<144x8xf32> -> vector<144x8xf32>
    %14 = arith.truncf %13 : vector<144x8xf32> to vector<144x8xbf16>
    %cst_13 = arith.constant 0.000000e+00 : f32
    %15 = vector.broadcast %cst_13 : f32 to vector<16x16xf32>
    %16 = vector.extract_strided_slice %14 {offsets = [0, 0], sizes = [16, 8], strides = [1, 1]} : vector<144x8xbf16> to vector<16x8xbf16>
    %17 = vector.extract_strided_slice %10 {offsets = [0, 0], sizes = [8, 16], strides = [1, 1]} : vector<72x16xbf16> to vector<8x16xbf16>
    %cst_14 = arith.constant dense<0.000000e+00> : vector<16x16xf32>
    %18 = tpu.matmul %16, %17, %cst_14 {dimension_numbers = #tpu.dot_dimension_numbers<[1], [0], [0], [1], [0, 0, 1, 1], [], []>} : vector<16x8xbf16>, vector<8x16xbf16>, vector<16x16xf32> -> vector<16x16xf32>
    %19 = arith.addf %15, %18 : vector<16x16xf32>
    %20 = vector.extract_strided_slice %14 {offsets = [16, 0], sizes = [16, 8], strides = [1, 1]} : vector<144x8xbf16> to vector<16x8xbf16>
    %21 = vector.extract_strided_slice %10 {offsets = [8, 0], sizes = [8, 16], strides = [1, 1]} : vector<72x16xbf16> to vector<8x16xbf16>
    %cst_15 = arith.constant dense<0.000000e+00> : vector<16x16xf32>
    %22 = tpu.matmul %20, %21, %cst_15 {dimension_numbers = #tpu.dot_dimension_numbers<[1], [0], [0], [1], [0, 0, 1, 1], [], []>} : vector<16x8xbf16>, vector<8x16xbf16>, vector<16x16xf32> -> vector<16x16xf32>
    %23 = arith.addf %19, %22 : vector<16x16xf32>
    %24 = vector.extract_strided_slice %14 {offsets = [32, 0], sizes = [16, 8], strides = [1, 1]} : vector<144x8xbf16> to vector<16x8xbf16>
    %25 = vector.extract_strided_slice %10 {offsets = [16, 0], sizes = [8, 16], strides = [1, 1]} : vector<72x16xbf16> to vector<8x16xbf16>
    %cst_16 = arith.constant dense<0.000000e+00> : vector<16x16xf32>
    %26 = tpu.matmul %24, %25, %cst_16 {dimension_numbers = #tpu.dot_dimension_numbers<[1], [0], [0], [1], [0, 0, 1, 1], [], []>} : vector<16x8xbf16>, vector<8x16xbf16>, vector<16x16xf32> -> vector<16x16xf32>
    %27 = arith.addf %23, %26 : vector<16x16xf32>
    %28 = vector.extract_strided_slice %14 {offsets = [48, 0], sizes = [16, 8], strides = [1, 1]} : vector<144x8xbf16> to vector<16x8xbf16>
    %29 = vector.extract_strided_slice %10 {offsets = [24, 0], sizes = [8, 16], strides = [1, 1]} : vector<72x16xbf16> to vector<8x16xbf16>
    %cst_17 = arith.constant dense<0.000000e+00> : vector<16x16xf32>
    %30 = tpu.matmul %28, %29, %cst_17 {dimension_numbers = #tpu.dot_dimension_numbers<[1], [0], [0], [1], [0, 0, 1, 1], [], []>} : vector<16x8xbf16>, vector<8x16xbf16>, vector<16x16xf32> -> vector<16x16xf32>
    %31 = arith.addf %27, %30 : vector<16x16xf32>
    %32 = vector.extract_strided_slice %14 {offsets = [64, 0], sizes = [16, 8], strides = [1, 1]} : vector<144x8xbf16> to vector<16x8xbf16>
    %33 = vector.extract_strided_slice %10 {offsets = [32, 0], sizes = [8, 16], strides = [1, 1]} : vector<72x16xbf16> to vector<8x16xbf16>
    %cst_18 = arith.constant dense<0.000000e+00> : vector<16x16xf32>
    %34 = tpu.matmul %32, %33, %cst_18 {dimension_numbers = #tpu.dot_dimension_numbers<[1], [0], [0], [1], [0, 0, 1, 1], [], []>} : vector<16x8xbf16>, vector<8x16xbf16>, vector<16x16xf32> -> vector<16x16xf32>
    %35 = arith.addf %31, %34 : vector<16x16xf32>
    %36 = vector.extract_strided_slice %14 {offsets = [80, 0], sizes = [16, 8], strides = [1, 1]} : vector<144x8xbf16> to vector<16x8xbf16>
    %37 = vector.extract_strided_slice %10 {offsets = [40, 0], sizes = [8, 16], strides = [1, 1]} : vector<72x16xbf16> to vector<8x16xbf16>
    %cst_19 = arith.constant dense<0.000000e+00> : vector<16x16xf32>
    %38 = tpu.matmul %36, %37, %cst_19 {dimension_numbers = #tpu.dot_dimension_numbers<[1], [0], [0], [1], [0, 0, 1, 1], [], []>} : vector<16x8xbf16>, vector<8x16xbf16>, vector<16x16xf32> -> vector<16x16xf32>
    %39 = arith.addf %35, %38 : vector<16x16xf32>
    %40 = vector.extract_strided_slice %14 {offsets = [96, 0], sizes = [16, 8], strides = [1, 1]} : vector<144x8xbf16> to vector<16x8xbf16>
    %41 = vector.extract_strided_slice %10 {offsets = [48, 0], sizes = [8, 16], strides = [1, 1]} : vector<72x16xbf16> to vector<8x16xbf16>
    %cst_20 = arith.constant dense<0.000000e+00> : vector<16x16xf32>
    %42 = tpu.matmul %40, %41, %cst_20 {dimension_numbers = #tpu.dot_dimension_numbers<[1], [0], [0], [1], [0, 0, 1, 1], [], []>} : vector<16x8xbf16>, vector<8x16xbf16>, vector<16x16xf32> -> vector<16x16xf32>
    %43 = arith.addf %39, %42 : vector<16x16xf32>
    %44 = vector.extract_strided_slice %14 {offsets = [112, 0], sizes = [16, 8], strides = [1, 1]} : vector<144x8xbf16> to vector<16x8xbf16>
    %45 = vector.extract_strided_slice %10 {offsets = [56, 0], sizes = [8, 16], strides = [1, 1]} : vector<72x16xbf16> to vector<8x16xbf16>
    %cst_21 = arith.constant dense<0.000000e+00> : vector<16x16xf32>
    %46 = tpu.matmul %44, %45, %cst_21 {dimension_numbers = #tpu.dot_dimension_numbers<[1], [0], [0], [1], [0, 0, 1, 1], [], []>} : vector<16x8xbf16>, vector<8x16xbf16>, vector<16x16xf32> -> vector<16x16xf32>
    %47 = arith.addf %43, %46 : vector<16x16xf32>
    %48 = vector.extract_strided_slice %14 {offsets = [128, 0], sizes = [16, 8], strides = [1, 1]} : vector<144x8xbf16> to vector<16x8xbf16>
    %49 = vector.extract_strided_slice %10 {offsets = [64, 0], sizes = [8, 16], strides = [1, 1]} : vector<72x16xbf16> to vector<8x16xbf16>
    %cst_22 = arith.constant dense<0.000000e+00> : vector<16x16xf32>
    %50 = tpu.matmul %48, %49, %cst_22 {dimension_numbers = #tpu.dot_dimension_numbers<[1], [0], [0], [1], [0, 0, 1, 1], [], []>} : vector<16x8xbf16>, vector<8x16xbf16>, vector<16x16xf32> -> vector<16x16xf32>
    %51 = arith.addf %47, %50 : vector<16x16xf32>
    %52 = vector.broadcast %11 : vector<1x16xf32> to vector<16x16xf32>
    %53 = arith.addf %51, %52 : vector<16x16xf32>
    %cst_23 = arith.constant 0.000000e+00 : f32
    %54 = vector.broadcast %cst_23 : f32 to vector<16x16xf32>
    %55 = arith.maximumf %53, %54 : vector<16x16xf32>
    %56 = arith.truncf %55 : vector<16x16xf32> to vector<16x16xbf16>
    %57 = vector.extract_strided_slice %56 {offsets = [0, 0], sizes = [1, 16], strides = [1, 1]} : vector<16x16xbf16> to vector<1x16xbf16>
    %c0_24 = arith.constant 0 : index
    %c0_25 = arith.constant 0 : index
    %58 = vector.load %arg16[%c0_24, %c0_25] : memref<2x256xbf16, #tpu.memory_space<vmem>>, vector<1x16xbf16>
    tpu.vector_store %arg16[%c0_24, %c0_25], %57 {strides = array<i32>} : memref<2x256xbf16, #tpu.memory_space<vmem>>, vector<1x16xbf16>,
    %59 = vector.extract_strided_slice %56 {offsets = [1, 0], sizes = [1, 16], strides = [1, 1]} : vector<16x16xbf16> to vector<1x16xbf16>
    %c0_26 = arith.constant 0 : index
    %c16 = arith.constant 16 : index
    %60 = vector.load %arg16[%c0_26, %c16] : memref<2x256xbf16, #tpu.memory_space<vmem>>, vector<1x16xbf16>
    tpu.vector_store %arg16[%c0_26, %c16], %59 {strides = array<i32>} : memref<2x256xbf16, #tpu.memory_space<vmem>>, vector<1x16xbf16>,
    %61 = vector.extract_strided_slice %56 {offsets = [2, 0], sizes = [1, 16], strides = [1, 1]} : vector<16x16xbf16> to vector<1x16xbf16>
    %c0_27 = arith.constant 0 : index
    %c32 = arith.constant 32 : index
    %62 = vector.load %arg16[%c0_27, %c32] : memref<2x256xbf16, #tpu.memory_space<vmem>>, vector<1x16xbf16>
    tpu.vector_store %arg16[%c0_27, %c32], %61 {strides = array<i32>} : memref<2x256xbf16, #tpu.memory_space<vmem>>, vector<1x16xbf16>,
    %63 = vector.extract_strided_slice %56 {offsets = [3, 0], sizes = [1, 16], strides = [1, 1]} : vector<16x16xbf16> to vector<1x16xbf16>
    %c0_28 = arith.constant 0 : index
    %c48 = arith.constant 48 : index
    %64 = vector.load %arg16[%c0_28, %c48] : memref<2x256xbf16, #tpu.memory_space<vmem>>, vector<1x16xbf16>
    tpu.vector_store %arg16[%c0_28, %c48], %63 {strides = array<i32>} : memref<2x256xbf16, #tpu.memory_space<vmem>>, vector<1x16xbf16>,
    %65 = vector.extract_strided_slice %56 {offsets = [4, 0], sizes = [1, 16], strides = [1, 1]} : vector<16x16xbf16> to vector<1x16xbf16>
    %c0_29 = arith.constant 0 : index
    %c64 = arith.constant 64 : index
    %66 = vector.load %arg16[%c0_29, %c64] : memref<2x256xbf16, #tpu.memory_space<vmem>>, vector<1x16xbf16>
    tpu.vector_store %arg16[%c0_29, %c64], %65 {strides = array<i32>} : memref<2x256xbf16, #tpu.memory_space<vmem>>, vector<1x16xbf16>,
    %67 = vector.extract_strided_slice %56 {offsets = [5, 0], sizes = [1, 16], strides = [1, 1]} : vector<16x16xbf16> to vector<1x16xbf16>
    %c0_30 = arith.constant 0 : index
    %c80 = arith.constant 80 : index
    %68 = vector.load %arg16[%c0_30, %c80] : memref<2x256xbf16, #tpu.memory_space<vmem>>, vector<1x16xbf16>
    tpu.vector_store %arg16[%c0_30, %c80], %67 {strides = array<i32>} : memref<2x256xbf16, #tpu.memory_space<vmem>>, vector<1x16xbf16>,
    %69 = vector.extract_strided_slice %56 {offsets = [6, 0], sizes = [1, 16], strides = [1, 1]} : vector<16x16xbf16> to vector<1x16xbf16>
    %c0_31 = arith.constant 0 : index
    %c96 = arith.constant 96 : index
    %70 = vector.load %arg16[%c0_31, %c96] : memref<2x256xbf16, #tpu.memory_space<vmem>>, vector<1x16xbf16>
    tpu.vector_store %arg16[%c0_31, %c96], %69 {strides = array<i32>} : memref<2x256xbf16, #tpu.memory_space<vmem>>, vector<1x16xbf16>,
    %71 = vector.extract_strided_slice %56 {offsets = [7, 0], sizes = [1, 16], strides = [1, 1]} : vector<16x16xbf16> to vector<1x16xbf16>
    %c0_32 = arith.constant 0 : index
    %c112 = arith.constant 112 : index
    %72 = vector.load %arg16[%c0_32, %c112] : memref<2x256xbf16, #tpu.memory_space<vmem>>, vector<1x16xbf16>
    tpu.vector_store %arg16[%c0_32, %c112], %71 {strides = array<i32>} : memref<2x256xbf16, #tpu.memory_space<vmem>>, vector<1x16xbf16>,
    %73 = vector.extract_strided_slice %56 {offsets = [8, 0], sizes = [1, 16], strides = [1, 1]} : vector<16x16xbf16> to vector<1x16xbf16>
    %c0_33 = arith.constant 0 : index
    %c128 = arith.constant 128 : index
    %74 = vector.load %arg16[%c0_33, %c128] : memref<2x256xbf16, #tpu.memory_space<vmem>>, vector<1x16xbf16>
    tpu.vector_store %arg16[%c0_33, %c128], %73 {strides = array<i32>} : memref<2x256xbf16, #tpu.memory_space<vmem>>, vector<1x16xbf16>,
    %75 = vector.extract_strided_slice %56 {offsets = [9, 0], sizes = [1, 16], strides = [1, 1]} : vector<16x16xbf16> to vector<1x16xbf16>
    %c0_34 = arith.constant 0 : index
    %c144 = arith.constant 144 : index
    %76 = vector.load %arg16[%c0_34, %c144] : memref<2x256xbf16, #tpu.memory_space<vmem>>, vector<1x16xbf16>
    tpu.vector_store %arg16[%c0_34, %c144], %75 {strides = array<i32>} : memref<2x256xbf16, #tpu.memory_space<vmem>>, vector<1x16xbf16>,
    %77 = vector.extract_strided_slice %56 {offsets = [10, 0], sizes = [1, 16], strides = [1, 1]} : vector<16x16xbf16> to vector<1x16xbf16>
    %c0_35 = arith.constant 0 : index
    %c160 = arith.constant 160 : index
    %78 = vector.load %arg16[%c0_35, %c160] : memref<2x256xbf16, #tpu.memory_space<vmem>>, vector<1x16xbf16>
    tpu.vector_store %arg16[%c0_35, %c160], %77 {strides = array<i32>} : memref<2x256xbf16, #tpu.memory_space<vmem>>, vector<1x16xbf16>,
    %79 = vector.extract_strided_slice %56 {offsets = [11, 0], sizes = [1, 16], strides = [1, 1]} : vector<16x16xbf16> to vector<1x16xbf16>
    %c0_36 = arith.constant 0 : index
    %c176 = arith.constant 176 : index
    %80 = vector.load %arg16[%c0_36, %c176] : memref<2x256xbf16, #tpu.memory_space<vmem>>, vector<1x16xbf16>
    tpu.vector_store %arg16[%c0_36, %c176], %79 {strides = array<i32>} : memref<2x256xbf16, #tpu.memory_space<vmem>>, vector<1x16xbf16>,
    %81 = vector.extract_strided_slice %56 {offsets = [12, 0], sizes = [1, 16], strides = [1, 1]} : vector<16x16xbf16> to vector<1x16xbf16>
    %c0_37 = arith.constant 0 : index
    %c192 = arith.constant 192 : index
    %82 = vector.load %arg16[%c0_37, %c192] : memref<2x256xbf16, #tpu.memory_space<vmem>>, vector<1x16xbf16>
    tpu.vector_store %arg16[%c0_37, %c192], %81 {strides = array<i32>} : memref<2x256xbf16, #tpu.memory_space<vmem>>, vector<1x16xbf16>,
    %83 = vector.extract_strided_slice %56 {offsets = [13, 0], sizes = [1, 16], strides = [1, 1]} : vector<16x16xbf16> to vector<1x16xbf16>
    %c0_38 = arith.constant 0 : index
    %c208 = arith.constant 208 : index
    %84 = vector.load %arg16[%c0_38, %c208] : memref<2x256xbf16, #tpu.memory_space<vmem>>, vector<1x16xbf16>
    tpu.vector_store %arg16[%c0_38, %c208], %83 {strides = array<i32>} : memref<2x256xbf16, #tpu.memory_space<vmem>>, vector<1x16xbf16>,
    %85 = vector.extract_strided_slice %56 {offsets = [14, 0], sizes = [1, 16], strides = [1, 1]} : vector<16x16xbf16> to vector<1x16xbf16>
    %c0_39 = arith.constant 0 : index
    %c224 = arith.constant 224 : index
    %86 = vector.load %arg16[%c0_39, %c224] : memref<2x256xbf16, #tpu.memory_space<vmem>>, vector<1x16xbf16>
    tpu.vector_store %arg16[%c0_39, %c224], %85 {strides = array<i32>} : memref<2x256xbf16, #tpu.memory_space<vmem>>, vector<1x16xbf16>,
    %87 = vector.extract_strided_slice %56 {offsets = [15, 0], sizes = [1, 16], strides = [1, 1]} : vector<16x16xbf16> to vector<1x16xbf16>
    %c0_40 = arith.constant 0 : index
    %c240 = arith.constant 240 : index
    %88 = vector.load %arg16[%c0_40, %c240] : memref<2x256xbf16, #tpu.memory_space<vmem>>, vector<1x16xbf16>
    tpu.vector_store %arg16[%c0_40, %c240], %87 {strides = array<i32>} : memref<2x256xbf16, #tpu.memory_space<vmem>>, vector<1x16xbf16>,
    %89 = vector.extract_strided_slice %8 {offsets = [64, 0], sizes = [64, 8], strides = [1, 1]} : vector<128x8xbf16> to vector<64x8xbf16>
    %cst_41 = arith.constant dense<0.000000e+00> : vector<144x8xf32>
    %90 = tpu.matmul %9, %89, %cst_41 {dimension_numbers = #tpu.dot_dimension_numbers<[1], [0], [0], [1], [0, 0, 1, 1], [], []>} : vector<144x64xbf16>, vector<64x8xbf16>, vector<144x8xf32> -> vector<144x8xf32>
    %91 = arith.truncf %90 : vector<144x8xf32> to vector<144x8xbf16>
    %cst_42 = arith.constant 0.000000e+00 : f32
    %92 = vector.broadcast %cst_42 : f32 to vector<16x16xf32>
    %93 = vector.extract_strided_slice %91 {offsets = [0, 0], sizes = [16, 8], strides = [1, 1]} : vector<144x8xbf16> to vector<16x8xbf16>
    %94 = vector.extract_strided_slice %10 {offsets = [0, 0], sizes = [8, 16], strides = [1, 1]} : vector<72x16xbf16> to vector<8x16xbf16>
    %cst_43 = arith.constant dense<0.000000e+00> : vector<16x16xf32>
    %95 = tpu.matmul %93, %94, %cst_43 {dimension_numbers = #tpu.dot_dimension_numbers<[1], [0], [0], [1], [0, 0, 1, 1], [], []>} : vector<16x8xbf16>, vector<8x16xbf16>, vector<16x16xf32> -> vector<16x16xf32>
    %96 = arith.addf %92, %95 : vector<16x16xf32>
    %97 = vector.extract_strided_slice %91 {offsets = [16, 0], sizes = [16, 8], strides = [1, 1]} : vector<144x8xbf16> to vector<16x8xbf16>
    %98 = vector.extract_strided_slice %10 {offsets = [8, 0], sizes = [8, 16], strides = [1, 1]} : vector<72x16xbf16> to vector<8x16xbf16>
    %cst_44 = arith.constant dense<0.000000e+00> : vector<16x16xf32>
    %99 = tpu.matmul %97, %98, %cst_44 {dimension_numbers = #tpu.dot_dimension_numbers<[1], [0], [0], [1], [0, 0, 1, 1], [], []>} : vector<16x8xbf16>, vector<8x16xbf16>, vector<16x16xf32> -> vector<16x16xf32>
    %100 = arith.addf %96, %99 : vector<16x16xf32>
    %101 = vector.extract_strided_slice %91 {offsets = [32, 0], sizes = [16, 8], strides = [1, 1]} : vector<144x8xbf16> to vector<16x8xbf16>
    %102 = vector.extract_strided_slice %10 {offsets = [16, 0], sizes = [8, 16], strides = [1, 1]} : vector<72x16xbf16> to vector<8x16xbf16>
    %cst_45 = arith.constant dense<0.000000e+00> : vector<16x16xf32>
    %103 = tpu.matmul %101, %102, %cst_45 {dimension_numbers = #tpu.dot_dimension_numbers<[1], [0], [0], [1], [0, 0, 1, 1], [], []>} : vector<16x8xbf16>, vector<8x16xbf16>, vector<16x16xf32> -> vector<16x16xf32>
    %104 = arith.addf %100, %103 : vector<16x16xf32>
    %105 = vector.extract_strided_slice %91 {offsets = [48, 0], sizes = [16, 8], strides = [1, 1]} : vector<144x8xbf16> to vector<16x8xbf16>
    %106 = vector.extract_strided_slice %10 {offsets = [24, 0], sizes = [8, 16], strides = [1, 1]} : vector<72x16xbf16> to vector<8x16xbf16>
    %cst_46 = arith.constant dense<0.000000e+00> : vector<16x16xf32>
    %107 = tpu.matmul %105, %106, %cst_46 {dimension_numbers = #tpu.dot_dimension_numbers<[1], [0], [0], [1], [0, 0, 1, 1], [], []>} : vector<16x8xbf16>, vector<8x16xbf16>, vector<16x16xf32> -> vector<16x16xf32>
    %108 = arith.addf %104, %107 : vector<16x16xf32>
    %109 = vector.extract_strided_slice %91 {offsets = [64, 0], sizes = [16, 8], strides = [1, 1]} : vector<144x8xbf16> to vector<16x8xbf16>
    %110 = vector.extract_strided_slice %10 {offsets = [32, 0], sizes = [8, 16], strides = [1, 1]} : vector<72x16xbf16> to vector<8x16xbf16>
    %cst_47 = arith.constant dense<0.000000e+00> : vector<16x16xf32>
    %111 = tpu.matmul %109, %110, %cst_47 {dimension_numbers = #tpu.dot_dimension_numbers<[1], [0], [0], [1], [0, 0, 1, 1], [], []>} : vector<16x8xbf16>, vector<8x16xbf16>, vector<16x16xf32> -> vector<16x16xf32>
    %112 = arith.addf %108, %111 : vector<16x16xf32>
    %113 = vector.extract_strided_slice %91 {offsets = [80, 0], sizes = [16, 8], strides = [1, 1]} : vector<144x8xbf16> to vector<16x8xbf16>
    %114 = vector.extract_strided_slice %10 {offsets = [40, 0], sizes = [8, 16], strides = [1, 1]} : vector<72x16xbf16> to vector<8x16xbf16>
    %cst_48 = arith.constant dense<0.000000e+00> : vector<16x16xf32>
    %115 = tpu.matmul %113, %114, %cst_48 {dimension_numbers = #tpu.dot_dimension_numbers<[1], [0], [0], [1], [0, 0, 1, 1], [], []>} : vector<16x8xbf16>, vector<8x16xbf16>, vector<16x16xf32> -> vector<16x16xf32>
    %116 = arith.addf %112, %115 : vector<16x16xf32>
    %117 = vector.extract_strided_slice %91 {offsets = [96, 0], sizes = [16, 8], strides = [1, 1]} : vector<144x8xbf16> to vector<16x8xbf16>
    %118 = vector.extract_strided_slice %10 {offsets = [48, 0], sizes = [8, 16], strides = [1, 1]} : vector<72x16xbf16> to vector<8x16xbf16>
    %cst_49 = arith.constant dense<0.000000e+00> : vector<16x16xf32>
    %119 = tpu.matmul %117, %118, %cst_49 {dimension_numbers = #tpu.dot_dimension_numbers<[1], [0], [0], [1], [0, 0, 1, 1], [], []>} : vector<16x8xbf16>, vector<8x16xbf16>, vector<16x16xf32> -> vector<16x16xf32>
    %120 = arith.addf %116, %119 : vector<16x16xf32>
    %121 = vector.extract_strided_slice %91 {offsets = [112, 0], sizes = [16, 8], strides = [1, 1]} : vector<144x8xbf16> to vector<16x8xbf16>
    %122 = vector.extract_strided_slice %10 {offsets = [56, 0], sizes = [8, 16], strides = [1, 1]} : vector<72x16xbf16> to vector<8x16xbf16>
    %cst_50 = arith.constant dense<0.000000e+00> : vector<16x16xf32>
    %123 = tpu.matmul %121, %122, %cst_50 {dimension_numbers = #tpu.dot_dimension_numbers<[1], [0], [0], [1], [0, 0, 1, 1], [], []>} : vector<16x8xbf16>, vector<8x16xbf16>, vector<16x16xf32> -> vector<16x16xf32>
    %124 = arith.addf %120, %123 : vector<16x16xf32>
    %125 = vector.extract_strided_slice %91 {offsets = [128, 0], sizes = [16, 8], strides = [1, 1]} : vector<144x8xbf16> to vector<16x8xbf16>
    %126 = vector.extract_strided_slice %10 {offsets = [64, 0], sizes = [8, 16], strides = [1, 1]} : vector<72x16xbf16> to vector<8x16xbf16>
    %cst_51 = arith.constant dense<0.000000e+00> : vector<16x16xf32>
    %127 = tpu.matmul %125, %126, %cst_51 {dimension_numbers = #tpu.dot_dimension_numbers<[1], [0], [0], [1], [0, 0, 1, 1], [], []>} : vector<16x8xbf16>, vector<8x16xbf16>, vector<16x16xf32> -> vector<16x16xf32>
    %128 = arith.addf %124, %127 : vector<16x16xf32>
    %129 = vector.broadcast %11 : vector<1x16xf32> to vector<16x16xf32>
    %130 = arith.addf %128, %129 : vector<16x16xf32>
    %cst_52 = arith.constant 0.000000e+00 : f32
    %131 = vector.broadcast %cst_52 : f32 to vector<16x16xf32>
    %132 = arith.maximumf %130, %131 : vector<16x16xf32>
    %133 = arith.truncf %132 : vector<16x16xf32> to vector<16x16xbf16>
    %134 = vector.extract_strided_slice %133 {offsets = [0, 0], sizes = [1, 16], strides = [1, 1]} : vector<16x16xbf16> to vector<1x16xbf16>
    %c1 = arith.constant 1 : index
    %c0_53 = arith.constant 0 : index
    %135 = vector.load %arg16[%c1, %c0_53] : memref<2x256xbf16, #tpu.memory_space<vmem>>, vector<1x16xbf16>
    tpu.vector_store %arg16[%c1, %c0_53], %134 {strides = array<i32>} : memref<2x256xbf16, #tpu.memory_space<vmem>>, vector<1x16xbf16>,
    %136 = vector.extract_strided_slice %133 {offsets = [1, 0], sizes = [1, 16], strides = [1, 1]} : vector<16x16xbf16> to vector<1x16xbf16>
    %c1_54 = arith.constant 1 : index
    %c16_55 = arith.constant 16 : index
    %137 = vector.load %arg16[%c1_54, %c16_55] : memref<2x256xbf16, #tpu.memory_space<vmem>>, vector<1x16xbf16>
    tpu.vector_store %arg16[%c1_54, %c16_55], %136 {strides = array<i32>} : memref<2x256xbf16, #tpu.memory_space<vmem>>, vector<1x16xbf16>,
    %138 = vector.extract_strided_slice %133 {offsets = [2, 0], sizes = [1, 16], strides = [1, 1]} : vector<16x16xbf16> to vector<1x16xbf16>
    %c1_56 = arith.constant 1 : index
    %c32_57 = arith.constant 32 : index
    %139 = vector.load %arg16[%c1_56, %c32_57] : memref<2x256xbf16, #tpu.memory_space<vmem>>, vector<1x16xbf16>
    tpu.vector_store %arg16[%c1_56, %c32_57], %138 {strides = array<i32>} : memref<2x256xbf16, #tpu.memory_space<vmem>>, vector<1x16xbf16>,
    %140 = vector.extract_strided_slice %133 {offsets = [3, 0], sizes = [1, 16], strides = [1, 1]} : vector<16x16xbf16> to vector<1x16xbf16>
    %c1_58 = arith.constant 1 : index
    %c48_59 = arith.constant 48 : index
    %141 = vector.load %arg16[%c1_58, %c48_59] : memref<2x256xbf16, #tpu.memory_space<vmem>>, vector<1x16xbf16>
    tpu.vector_store %arg16[%c1_58, %c48_59], %140 {strides = array<i32>} : memref<2x256xbf16, #tpu.memory_space<vmem>>, vector<1x16xbf16>,
    %142 = vector.extract_strided_slice %133 {offsets = [4, 0], sizes = [1, 16], strides = [1, 1]} : vector<16x16xbf16> to vector<1x16xbf16>
    %c1_60 = arith.constant 1 : index
    %c64_61 = arith.constant 64 : index
    %143 = vector.load %arg16[%c1_60, %c64_61] : memref<2x256xbf16, #tpu.memory_space<vmem>>, vector<1x16xbf16>
    tpu.vector_store %arg16[%c1_60, %c64_61], %142 {strides = array<i32>} : memref<2x256xbf16, #tpu.memory_space<vmem>>, vector<1x16xbf16>,
    %144 = vector.extract_strided_slice %133 {offsets = [5, 0], sizes = [1, 16], strides = [1, 1]} : vector<16x16xbf16> to vector<1x16xbf16>
    %c1_62 = arith.constant 1 : index
    %c80_63 = arith.constant 80 : index
    %145 = vector.load %arg16[%c1_62, %c80_63] : memref<2x256xbf16, #tpu.memory_space<vmem>>, vector<1x16xbf16>
    tpu.vector_store %arg16[%c1_62, %c80_63], %144 {strides = array<i32>} : memref<2x256xbf16, #tpu.memory_space<vmem>>, vector<1x16xbf16>,
    %146 = vector.extract_strided_slice %133 {offsets = [6, 0], sizes = [1, 16], strides = [1, 1]} : vector<16x16xbf16> to vector<1x16xbf16>
    %c1_64 = arith.constant 1 : index
    %c96_65 = arith.constant 96 : index
    %147 = vector.load %arg16[%c1_64, %c96_65] : memref<2x256xbf16, #tpu.memory_space<vmem>>, vector<1x16xbf16>
    tpu.vector_store %arg16[%c1_64, %c96_65], %146 {strides = array<i32>} : memref<2x256xbf16, #tpu.memory_space<vmem>>, vector<1x16xbf16>,
    %148 = vector.extract_strided_slice %133 {offsets = [7, 0], sizes = [1, 16], strides = [1, 1]} : vector<16x16xbf16> to vector<1x16xbf16>
    %c1_66 = arith.constant 1 : index
    %c112_67 = arith.constant 112 : index
    %149 = vector.load %arg16[%c1_66, %c112_67] : memref<2x256xbf16, #tpu.memory_space<vmem>>, vector<1x16xbf16>
    tpu.vector_store %arg16[%c1_66, %c112_67], %148 {strides = array<i32>} : memref<2x256xbf16, #tpu.memory_space<vmem>>, vector<1x16xbf16>,
    %150 = vector.extract_strided_slice %133 {offsets = [8, 0], sizes = [1, 16], strides = [1, 1]} : vector<16x16xbf16> to vector<1x16xbf16>
    %c1_68 = arith.constant 1 : index
    %c128_69 = arith.constant 128 : index
    %151 = vector.load %arg16[%c1_68, %c128_69] : memref<2x256xbf16, #tpu.memory_space<vmem>>, vector<1x16xbf16>
    tpu.vector_store %arg16[%c1_68, %c128_69], %150 {strides = array<i32>} : memref<2x256xbf16, #tpu.memory_space<vmem>>, vector<1x16xbf16>,
    %152 = vector.extract_strided_slice %133 {offsets = [9, 0], sizes = [1, 16], strides = [1, 1]} : vector<16x16xbf16> to vector<1x16xbf16>
    %c1_70 = arith.constant 1 : index
    %c144_71 = arith.constant 144 : index
    %153 = vector.load %arg16[%c1_70, %c144_71] : memref<2x256xbf16, #tpu.memory_space<vmem>>, vector<1x16xbf16>
    tpu.vector_store %arg16[%c1_70, %c144_71], %152 {strides = array<i32>} : memref<2x256xbf16, #tpu.memory_space<vmem>>, vector<1x16xbf16>,
    %154 = vector.extract_strided_slice %133 {offsets = [10, 0], sizes = [1, 16], strides = [1, 1]} : vector<16x16xbf16> to vector<1x16xbf16>
    %c1_72 = arith.constant 1 : index
    %c160_73 = arith.constant 160 : index
    %155 = vector.load %arg16[%c1_72, %c160_73] : memref<2x256xbf16, #tpu.memory_space<vmem>>, vector<1x16xbf16>
    tpu.vector_store %arg16[%c1_72, %c160_73], %154 {strides = array<i32>} : memref<2x256xbf16, #tpu.memory_space<vmem>>, vector<1x16xbf16>,
    %156 = vector.extract_strided_slice %133 {offsets = [11, 0], sizes = [1, 16], strides = [1, 1]} : vector<16x16xbf16> to vector<1x16xbf16>
    %c1_74 = arith.constant 1 : index
    %c176_75 = arith.constant 176 : index
    %157 = vector.load %arg16[%c1_74, %c176_75] : memref<2x256xbf16, #tpu.memory_space<vmem>>, vector<1x16xbf16>
    tpu.vector_store %arg16[%c1_74, %c176_75], %156 {strides = array<i32>} : memref<2x256xbf16, #tpu.memory_space<vmem>>, vector<1x16xbf16>,
    %158 = vector.extract_strided_slice %133 {offsets = [12, 0], sizes = [1, 16], strides = [1, 1]} : vector<16x16xbf16> to vector<1x16xbf16>
    %c1_76 = arith.constant 1 : index
    %c192_77 = arith.constant 192 : index
    %159 = vector.load %arg16[%c1_76, %c192_77] : memref<2x256xbf16, #tpu.memory_space<vmem>>, vector<1x16xbf16>
    tpu.vector_store %arg16[%c1_76, %c192_77], %158 {strides = array<i32>} : memref<2x256xbf16, #tpu.memory_space<vmem>>, vector<1x16xbf16>,
    %160 = vector.extract_strided_slice %133 {offsets = [13, 0], sizes = [1, 16], strides = [1, 1]} : vector<16x16xbf16> to vector<1x16xbf16>
    %c1_78 = arith.constant 1 : index
    %c208_79 = arith.constant 208 : index
    %161 = vector.load %arg16[%c1_78, %c208_79] : memref<2x256xbf16, #tpu.memory_space<vmem>>, vector<1x16xbf16>
    tpu.vector_store %arg16[%c1_78, %c208_79], %160 {strides = array<i32>} : memref<2x256xbf16, #tpu.memory_space<vmem>>, vector<1x16xbf16>,
    %162 = vector.extract_strided_slice %133 {offsets = [14, 0], sizes = [1, 16], strides = [1, 1]} : vector<16x16xbf16> to vector<1x16xbf16>
    %c1_80 = arith.constant 1 : index
    %c224_81 = arith.constant 224 : index
    %163 = vector.load %arg16[%c1_80, %c224_81] : memref<2x256xbf16, #tpu.memory_space<vmem>>, vector<1x16xbf16>
    tpu.vector_store %arg16[%c1_80, %c224_81], %162 {strides = array<i32>} : memref<2x256xbf16, #tpu.memory_space<vmem>>, vector<1x16xbf16>,
    %164 = vector.extract_strided_slice %133 {offsets = [15, 0], sizes = [1, 16], strides = [1, 1]} : vector<16x16xbf16> to vector<1x16xbf16>
    %c1_82 = arith.constant 1 : index
    %c240_83 = arith.constant 240 : index
    %165 = vector.load %arg16[%c1_82, %c240_83] : memref<2x256xbf16, #tpu.memory_space<vmem>>, vector<1x16xbf16>
    tpu.vector_store %arg16[%c1_82, %c240_83], %164 {strides = array<i32>} : memref<2x256xbf16, #tpu.memory_space<vmem>>, vector<1x16xbf16>,
    %c0_84 = arith.constant 0 : index
    %c0_85 = arith.constant 0 : index
    %166 = vector.load %arg16[%c0_84, %c0_85] : memref<2x256xbf16, #tpu.memory_space<vmem>>, vector<2x256xbf16>
    %c0_86 = arith.constant 0 : index
    %c0_87 = arith.constant 0 : index
    %167 = vector.load %arg7[%c0_86, %c0_87] : memref<256x128xbf16, #tpu.memory_space<vmem>>, vector<256x128xbf16>
    %cst_88 = arith.constant dense<0.000000e+00> : vector<2x128xf32>
    %168 = tpu.matmul %166, %167, %cst_88 {dimension_numbers = #tpu.dot_dimension_numbers<[1], [0], [0], [1], [0, 0, 1, 1], [], []>} : vector<2x256xbf16>, vector<256x128xbf16>, vector<2x128xf32> -> vector<2x128xf32>
    %c0_89 = arith.constant 0 : index
    %c0_90 = arith.constant 0 : index
    %169 = vector.load %arg8[%c0_89, %c0_90] : memref<1x128xf32, #tpu.memory_space<vmem>>, vector<1x128xf32>
    %170 = vector.broadcast %169 : vector<1x128xf32> to vector<2x128xf32>
    %171 = arith.addf %168, %170 : vector<2x128xf32>
    %cst_91 = arith.constant 0.000000e+00 : f32
    %172 = vector.broadcast %cst_91 : f32 to vector<2x128xf32>
    %173 = arith.maximumf %171, %172 : vector<2x128xf32>
    %174 = arith.truncf %173 : vector<2x128xf32> to vector<2x128xbf16>
    %c0_92 = arith.constant 0 : index
    %c0_93 = arith.constant 0 : index
    %175 = vector.load %arg9[%c0_92, %c0_93] : memref<128x128xbf16, #tpu.memory_space<vmem>>, vector<128x128xbf16>
    %cst_94 = arith.constant dense<0.000000e+00> : vector<2x128xf32>
    %176 = tpu.matmul %174, %175, %cst_94 {dimension_numbers = #tpu.dot_dimension_numbers<[1], [0], [0], [1], [0, 0, 1, 1], [], []>} : vector<2x128xbf16>, vector<128x128xbf16>, vector<2x128xf32> -> vector<2x128xf32>
    %c0_95 = arith.constant 0 : index
    %c0_96 = arith.constant 0 : index
    %177 = vector.load %arg10[%c0_95, %c0_96] : memref<1x128xf32, #tpu.memory_space<vmem>>, vector<1x128xf32>
    %178 = vector.broadcast %177 : vector<1x128xf32> to vector<2x128xf32>
    %179 = arith.addf %176, %178 : vector<2x128xf32>
    %cst_97 = arith.constant 0.000000e+00 : f32
    %180 = vector.broadcast %cst_97 : f32 to vector<2x128xf32>
    %181 = arith.maximumf %179, %180 : vector<2x128xf32>
    %182 = arith.truncf %181 : vector<2x128xf32> to vector<2x128xbf16>
    %c0_98 = arith.constant 0 : index
    %c0_99 = arith.constant 0 : index
    %183 = vector.load %arg11[%c0_98, %c0_99] : memref<128x128xbf16, #tpu.memory_space<vmem>>, vector<128x128xbf16>
    %cst_100 = arith.constant dense<0.000000e+00> : vector<2x128xf32>
    %184 = tpu.matmul %182, %183, %cst_100 {dimension_numbers = #tpu.dot_dimension_numbers<[1], [0], [0], [1], [0, 0, 1, 1], [], []>} : vector<2x128xbf16>, vector<128x128xbf16>, vector<2x128xf32> -> vector<2x128xf32>
    %c0_101 = arith.constant 0 : index
    %c0_102 = arith.constant 0 : index
    %185 = vector.load %arg12[%c0_101, %c0_102] : memref<1x128xf32, #tpu.memory_space<vmem>>, vector<1x128xf32>
    %186 = vector.broadcast %185 : vector<1x128xf32> to vector<2x128xf32>
    %187 = arith.addf %184, %186 : vector<2x128xf32>
    %cst_103 = arith.constant 0.000000e+00 : f32
    %188 = vector.broadcast %cst_103 : f32 to vector<2x128xf32>
    %189 = arith.maximumf %187, %188 : vector<2x128xf32>
    %190 = arith.truncf %189 : vector<2x128xf32> to vector<2x128xbf16>
    %c0_104 = arith.constant 0 : index
    %c0_105 = arith.constant 0 : index
    %191 = vector.load %arg13[%c0_104, %c0_105] : memref<128x128xbf16, #tpu.memory_space<vmem>>, vector<128x128xbf16>
    %cst_106 = arith.constant dense<0.000000e+00> : vector<2x128xf32>
    %192 = tpu.matmul %190, %191, %cst_106 {dimension_numbers = #tpu.dot_dimension_numbers<[1], [0], [0], [1], [0, 0, 1, 1], [], []>} : vector<2x128xbf16>, vector<128x128xbf16>, vector<2x128xf32> -> vector<2x128xf32>
    %c0_107 = arith.constant 0 : index
    %c0_108 = arith.constant 0 : index
    %193 = vector.load %arg14[%c0_107, %c0_108] : memref<1x128xf32, #tpu.memory_space<vmem>>, vector<1x128xf32>
    %194 = vector.broadcast %193 : vector<1x128xf32> to vector<2x128xf32>
    %195 = arith.addf %192, %194 : vector<2x128xf32>
    %c0_109 = arith.constant 0 : index
    %c0_110 = arith.constant 0 : index
    %196 = vector.load %arg15[%c0_109, %c0_110] : memref<2x128xf32, #tpu.memory_space<vmem>>, vector<2x128xf32>
    tpu.vector_store %arg15[%c0_109, %c0_110], %195 {strides = array<i32>} : memref<2x128xf32, #tpu.memory_space<vmem>>, vector<2x128xf32>,
    return
  }
  func.func @transform_0(%arg0: i32) -> (i32, i32) {
    %c0_i32 = arith.constant 0 : i32
    %c0_i32_0 = arith.constant 0 : i32
    return %arg0, %c0_i32 : i32, i32
  }
  func.func @transform_1(%arg0: i32) -> (i32, i32) {
    %c0_i32 = arith.constant 0 : i32
    %c0_i32_0 = arith.constant 0 : i32
    %c0_i32_1 = arith.constant 0 : i32
    return %c0_i32, %c0_i32_0 : i32, i32
  }
  func.func @transform_2(%arg0: i32) -> (i32, i32) {
    %c0_i32 = arith.constant 0 : i32
    %c0_i32_0 = arith.constant 0 : i32
    %c0_i32_1 = arith.constant 0 : i32
    return %c0_i32, %c0_i32_0 : i32, i32
  }
  func.func @transform_3(%arg0: i32) -> (i32, i32) {
    %c0_i32 = arith.constant 0 : i32
    %c0_i32_0 = arith.constant 0 : i32
    %c0_i32_1 = arith.constant 0 : i32
    return %c0_i32, %c0_i32_0 : i32, i32
  }
  func.func @transform_4(%arg0: i32) -> (i32, i32) {
    %c0_i32 = arith.constant 0 : i32
    %c0_i32_0 = arith.constant 0 : i32
    %c0_i32_1 = arith.constant 0 : i32
    return %c0_i32, %c0_i32_0 : i32, i32
  }
  func.func @transform_5(%arg0: i32) -> (i32, i32) {
    %c0_i32 = arith.constant 0 : i32
    %c0_i32_0 = arith.constant 0 : i32
    %c0_i32_1 = arith.constant 0 : i32
    return %c0_i32, %c0_i32_0 : i32, i32
  }
  func.func @transform_6(%arg0: i32) -> (i32, i32) {
    %c0_i32 = arith.constant 0 : i32
    %c0_i32_0 = arith.constant 0 : i32
    %c0_i32_1 = arith.constant 0 : i32
    return %c0_i32, %c0_i32_0 : i32, i32
  }
  func.func @transform_7(%arg0: i32) -> (i32, i32) {
    %c0_i32 = arith.constant 0 : i32
    %c0_i32_0 = arith.constant 0 : i32
    %c0_i32_1 = arith.constant 0 : i32
    return %c0_i32, %c0_i32_0 : i32, i32
  }
  func.func @transform_8(%arg0: i32) -> (i32, i32) {
    %c0_i32 = arith.constant 0 : i32
    %c0_i32_0 = arith.constant 0 : i32
    %c0_i32_1 = arith.constant 0 : i32
    return %c0_i32, %c0_i32_0 : i32, i32
  }
  func.func @transform_9(%arg0: i32) -> (i32, i32) {
    %c0_i32 = arith.constant 0 : i32
    %c0_i32_0 = arith.constant 0 : i32
    %c0_i32_1 = arith.constant 0 : i32
    return %c0_i32, %c0_i32_0 : i32, i32
  }
  func.func @transform_10(%arg0: i32) -> (i32, i32) {
    %c0_i32 = arith.constant 0 : i32
    %c0_i32_0 = arith.constant 0 : i32
    %c0_i32_1 = arith.constant 0 : i32
    return %c0_i32, %c0_i32_0 : i32, i32
  }
  func.func @transform_11(%arg0: i32) -> (i32, i32) {
    %c0_i32 = arith.constant 0 : i32
    %c0_i32_0 = arith.constant 0 : i32
    %c0_i32_1 = arith.constant 0 : i32
    return %c0_i32, %c0_i32_0 : i32, i32
  }
  func.func @transform_12(%arg0: i32) -> (i32, i32) {
    %c0_i32 = arith.constant 0 : i32
    %c0_i32_0 = arith.constant 0 : i32
    %c0_i32_1 = arith.constant 0 : i32
    return %c0_i32, %c0_i32_0 : i32, i32
  }
  func.func @transform_13(%arg0: i32) -> (i32, i32) {
    %c0_i32 = arith.constant 0 : i32
    %c0_i32_0 = arith.constant 0 : i32
    %c0_i32_1 = arith.constant 0 : i32
    return %c0_i32, %c0_i32_0 : i32, i32
  }
  func.func @transform_14(%arg0: i32) -> (i32, i32) {
    %c0_i32 = arith.constant 0 : i32
    %c0_i32_0 = arith.constant 0 : i32
    return %arg0, %c0_i32 : i32, i32
  }
}

</mosaic_0001>

<bundles_post_ra>
// kernel: conv_ae_classifier_forward.1
= control target key start
LH: loop header
LB: loop body
LE: loop exit
PB: predicated region body
PF: predicated region fallthrough
CT: control target
= control target key end

     0   :  { %vm157_vm0 = vcmask 1041408   ;;  %vm132_vm1 = vcmask 293888   ;;  %s3741_s0 = inlined_call_operand.vmem [shape: bf16[128,36], index: 0, kind: input, shape index: {}]   ;;  %s3742_s1 = inlined_call_operand.vmem [shape: bf16[36,8], index: 1, kind: input, shape index: {}]   ;;  %s3743_s2 = inlined_call_operand.vmem [shape: f32[1,8], index: 2, kind: input, shape index: {}]   ;;  %s3744_s3 = inlined_call_operand.vmem [shape: bf16[144,64], index: 3, kind: input, shape index: {}]   ;;  %s3745_s4 = inlined_call_operand.vmem [shape: bf16[72,16], index: 4, kind: input, shape index: {}]   ;;  %s3746_s5 = inlined_call_operand.vmem [shape: f32[1,16], index: 5, kind: input, shape index: {}]   ;;  %s3747_s6 = inlined_call_operand.vmem [shape: bf16[256,128], index: 6, kind: input, shape index: {}]   ;;  %s3748_s7 = inlined_call_operand.vmem [shape: f32[1,128], index: 7, kind: input, shape index: {}]   ;;  %s3749_s8 = inlined_call_operand.vmem [shape: bf16[128,128], index: 8, kind: input, shape index: {}]   ;;  %s3750_s9 = inlined_call_operand.vmem [shape: f32[1,128], index: 9, kind: input, shape index: {}]   ;;  %s3751_s10 = inlined_call_operand.vmem [shape: bf16[128,128], index: 10, kind: input, shape index: {}]   ;;  %s3752_s11 = inlined_call_operand.vmem [shape: f32[1,128], index: 11, kind: input, shape index: {}]   ;;  %s3753_s12 = inlined_call_operand.vmem [shape: bf16[128,128], index: 12, kind: input, shape index: {}]   ;;  %s3754_s13 = inlined_call_operand.vmem [shape: f32[1,128], index: 13, kind: input, shape index: {}]   ;;  %s3755_s14 = inlined_call_operand.hbm [shape: f32[2,128], index: 14, kind: output, shape index: {}]  }
   0x1   :  { %v2960_v0 = vld [vmem:[%s3742_s1] sm:$0xff]   ;;  %v2961_v1 = vld [vmem:[%s3742_s1 + $0x8] sm:$0xff]   ;;  %v2962_v2 = vld [vmem:[%s3742_s1 + $0x10] ss:$0 sps:$4 sm:$0x33]  }
   0x2   :  { %2647 = vmatprep.subr.bf16.mxu0 %v2960_v0  ;;  %v2963_v3 = vld [vmem:[%s3741_s0] sm:$0xff]   ;;  %v159_v4 = vsel %vm157_vm0, %v2962_v2, 0  ;;  %v2964_v5 = vld [vmem:[%s3741_s0 + $0x8] sm:$0xff]   ;;  %v2965_v6 = vld [vmem:[%s3741_s0 + $0x10] sm:$0xff]  }
   0x3   :  { %2648 = vmatpush3.bf16.msra.mxu0 %v2960_v0  ;;  %2653 = vmatprep.mubr.msk.bf16.mxu0 %vm132_vm1, %v2963_v3  ;;  %v2966_v7 = vld [vmem:[%s3741_s0 + $0x18] sm:$0xff]  }
   0x4   :  { %2649 = vmatprep.subr.bf16.mxu0 %v2961_v1 }
   0x7   :  { %2650 = vmatpush3.bf16.msra.mxu0 %v2961_v1 }
   0x8   :  { %2933 = vmatprep.subr.msk.bf16.mxu0 %vm157_vm0, %v2962_v2 }
   0xb   :  { %2652 = vmatpush3.bf16.msra.mxu0 %v159_v4 }
   0xe   :  { %2654 = vmatmul.mubr.msk.bf16.vlgmr.msra.gmra.mrb[0].mxu0 %vm132_vm1, %v2964_v5 }
   0xf   :  { %2657 = vmatprep.mubr.msk.bf16.mxu0 %vm132_vm1, %v2965_v6 }
  0x16   :  { %2658 = vmatmul.mubr.msk.bf16.gmra.mrb[4].mxu0 %vm132_vm1, %v2966_v7 }
  0x17   :  { %19 = vsyncpa [#allocation4], 0  ;;  %v3044_v8 = vmov 0.0   ;;  %v2967_v9 = vld [vmem:[%s3741_s0 + $0x20] sm:$0xff]   ;;  %v2968_v10 = vld [vmem:[%s3741_s0 + $0x28] sm:$0xff]   ;;  %vm3045_vm2 = vmmov 0  }
  0x18   :  { %2669 = vmatprep.subr.bf16.mxu0 %v3044_v8  ;;  %2925 = vmatprep.subr.bf16.mxu1 %v3044_v8  ;;  %v2969_v11 = vld [vmem:[%s3741_s0 + $0x30] sm:$0xff]   ;;  %v2970_v12 = vld [vmem:[%s3741_s0 + $0x38] sm:$0xff]   ;;  %v3180_v13 = vld [vmem:[%s3743_s2] ss:$0 sm:$0xff]  ;;  %vm355_vm3 = vcmask 523264   ;;  %vm501_vm4 = vcmask 1043456  }
  0x19   :  { %2661 = vmatprep.mubr.msk.bf16.mxu0 %vm132_vm1, %v2967_v9  ;;  %2681 = vmatprep.mubr.msk.bf16.mxu1 %vm3045_vm2, %v3044_v8  ;;  %v3199_v42 = vld [vmem:[%s3744_s3 + $0x8] sm:$0xff]   ;;  %v3204_v43 = vld [vmem:[%s3744_s3] sm:$0xff]   ;;  %v3219_v44 = vld [vmem:[%s3744_s3 + $0x10] sm:$0xff]   ;;  %vm497_vm5 = vcmask 64512   ;;  %vm947_vm6 = vcmask 122880   ;;  %s3048_s18 = smov 16  }
  0x1a   :  { %v3228_v45 = vld [vmem:[%s3744_s3 + $0x18] sm:$0xff]   ;;  %v3237_v46 = vld [vmem:[%s3744_s3 + $0x20] sm:$0xff]   ;;  %v3246_v47 = vld [vmem:[%s3744_s3 + $0x28] sm:$0xff]   ;;  %vm948_vm7 = vsmask.f32 256  ;;  %s3050_s19 = smov 64  }
  0x1b   :  { %v3255_v48 = vld [vmem:[%s3744_s3 + $0x30] sm:$0xff]   ;;  %v3264_v49 = vld [vmem:[%s3744_s3 + $0x38] sm:$0xff]   ;;  %v3273_v50 = vld [vmem:[%s3744_s3 + $0x40] sm:$0xff]   ;;  %s3049_s3 = smov 48   ;;  %s3051_s0 = smov 80   ;;  %vm976_vm9 = vcmask 254080  }
  0x1c   :  { %v301_v4 = vld [vmem:[%s3745_s4 + $0x4] sm:$0xf]  ;;  %vm3448_vm8 = vmand %vm947_vm6, %vm948_vm7  ;;  %s3052_s2 = smov 96   ;;  %s3053_s20 = smov 112   ;;  %vm992_vm11 = vcmask 385280   ;;  %vm1005_vm13 = vcmask 516480  }
  0x1d   :  { %v3291_v6 = vsel %vm501_vm4, %v301_v4, 0  ;;  %vm977_vm10 = vmand %vm976_vm9, %vm948_vm7  ;;  %vm1014_vm15 = vcmask 647680  }
  0x1e   :  { %2662 = vmatmul.mubr.msk.bf16.gmra.mrb[8].mxu0 %vm132_vm1, %v2968_v10  ;;  %vm993_vm12 = vmand %vm992_vm11, %vm948_vm7 }
  0x1f   :  { %2665 = vmatprep.mubr.msk.bf16.mxu0 %vm132_vm1, %v2969_v11  ;;  %vm1006_vm14 = vmand %vm1005_vm13, %vm948_vm7 }
  0x20   :  { %vm1015_vm0 = vmand %vm1014_vm15, %vm948_vm7 }
  0x26   :  { %2666 = vmatmul.mubr.msk.bf16.gmra.mrb[12].mxu0 %vm132_vm1, %v2970_v12  ;;  %vm1027_vm1 = vcmask 778880  }
  0x27   :  { %2677 = vmatprep.mubr.msk.bf16.mxu0 %vm3045_vm2, %v3044_v8 }
  0xe1   :  { %v2655_v14 = vpop.f32.mrb[0].mxu0 }
  0xe2   :  { %v204_v15 = vadd.f32 %v2655_v14, %v3180_v13  ;;  %v195_v16 = vpop.f32.mrb[1].mxu0 }
  0xe3   :  { %v196_v17 = vadd.f32 %v3180_v13, %v195_v16  ;;  %v2656_v18 = vpop.f32.mrb[2].mxu0 }
  0xe4   :  { %v207_v19 = vadd.f32 %v2656_v18, %v3180_v13  ;;  %v198_v20 = vpop.f32.mrb[3].mxu0  ;;  %v260_v22 = vmax.f32 %v204_v15, 0.0 }
  0xe5   :  { %v199_v21 = vadd.f32 %v3180_v13, %v198_v20  ;;  %v258_v24 = vmax.f32 %v196_v17, 0.0 }
  0xe6   :  { %v261_v23 = vmax.f32 %v207_v19, 0.0  ;;  %v306_v19 = vld [vmem:[%s3745_s4 + $0x18] sm:$0xf] }
  0xe7   :  { %v259_v25 = vmax.f32 %v199_v21, 0.0  ;;  %v3307_v20 = vsel %vm501_vm4, %v306_v19, 0 }
  0xe8   :  { %v275_v26 = vpack.c.bf16 %v261_v23, %v260_v22  ;;  %v300_v22 = vld [vmem:[%s3745_s4] sm:$0xf] }
  0xe9   :  { %v274_v27 = vpack.c.bf16 %v259_v25, %v258_v24  ;;  %v2659_v28 = vpop.f32.mrb[4].mxu0 }
  0xea   :  { %v220_v29 = vadd.f32 %v2659_v28, %v3180_v13  ;;  %v211_v30 = vpop.f32.mrb[5].mxu0 }
  0xeb   :  { %v212_v31 = vadd.f32 %v3180_v13, %v211_v30  ;;  %v2660_v32 = vpop.f32.mrb[6].mxu0  ;;  %2670 = vmatpush3.bf16.msra.mxu0 %v274_v27  ;;  %2929 = vmatpush3.bf16.msra.mxu1 %v274_v27  ;;  %v3315_v30 = vsel %vm501_vm4, %v300_v22, 0 }
  0xec   :  { %v223_v33 = vadd.f32 %v2660_v32, %v3180_v13  ;;  %v214_v34 = vpop.f32.mrb[7].mxu0  ;;  %2671 = vmatprep.subr.bf16.mxu0 %v3044_v8  ;;  %2926 = vmatprep.subr.bf16.mxu1 %v3044_v8  ;;  %v264_v36 = vmax.f32 %v220_v29, 0.0 }
  0xed   :  { %v215_v35 = vadd.f32 %v3180_v13, %v214_v34  ;;  %v262_v38 = vmax.f32 %v212_v31, 0.0 }
  0xee   :  { %v265_v37 = vmax.f32 %v223_v33, 0.0  ;;  %v302_v33 = vld [vmem:[%s3745_s4 + $0x8] sm:$0xf] }
  0xef   :  { %v263_v39 = vmax.f32 %v215_v35, 0.0  ;;  %2672 = vmatpush3.bf16.msra.mxu0 %v275_v26  ;;  %2930 = vmatpush3.bf16.msra.mxu1 %v275_v26 }
  0xf0   :  { %v277_v40 = vpack.c.bf16 %v265_v37, %v264_v36  ;;  %2927 = vmatprep.subr.bf16.mxu1 %v3044_v8  ;;  %2673 = vmatprep.subr.bf16.mxu0 %v3044_v8 }
  0xf1   :  { %v276_v41 = vpack.c.bf16 %v263_v39, %v262_v38  ;;  %v2663_v51 = vpop.f32.mrb[8].mxu0  ;;  %v3326_v38 = vsel %vm501_vm4, %v302_v33, 0 }
  0xf2   :  { %v236_v52 = vadd.f32 %v2663_v51, %v3180_v13  ;;  %v227_v53 = vpop.f32.mrb[9].mxu0 }
  0xf3   :  { %2931 = vmatpush3.bf16.msra.mxu1 %v276_v41  ;;  %2674 = vmatpush3.bf16.msra.mxu0 %v276_v41  ;;  %v228_v54 = vadd.f32 %v3180_v13, %v227_v53  ;;  %v2664_v55 = vpop.f32.mrb[10].mxu0 }
  0xf4   :  { %2928 = vmatprep.subr.bf16.mxu1 %v3044_v8  ;;  %2675 = vmatprep.subr.bf16.mxu0 %v3044_v8  ;;  %v268_v56 = vmax.f32 %v236_v52, 0.0  ;;  %v239_v57 = vadd.f32 %v2664_v55, %v3180_v13  ;;  %v230_v58 = vpop.f32.mrb[11].mxu0 }
  0xf5   :  { %v266_v59 = vmax.f32 %v228_v54, 0.0  ;;  %v231_v60 = vadd.f32 %v3180_v13, %v230_v58 }
  0xf6   :  { %v269_v61 = vmax.f32 %v239_v57, 0.0 }
  0xf7   :  { %2932 = vmatpush3.bf16.msra.mxu1 %v277_v40  ;;  %2676 = vmatpush3.bf16.msra.mxu0 %v277_v40  ;;  %v267_v62 = vmax.f32 %v231_v60, 0.0  ;;  %v303_v40 = vld [vmem:[%s3745_s4 + $0xc] sm:$0xf] }
  0xf8   :  { %2713 = vmatprep.subr.bf16.mxu0 %v3044_v8  ;;  %2749 = vmatprep.subr.bf16.mxu1 %v3044_v8  ;;  %v3283_v63 = vpack.c.bf16 %v269_v61, %v268_v56  ;;  %v3337_v54 = vsel %vm501_vm4, %v303_v40, 0  ;;  %v304_v56 = vld [vmem:[%s3745_s4 + $0x10] sm:$0xf] }
  0xf9   :  { %v3285_v0 = vpack.c.bf16 %v267_v62, %v266_v59  ;;  %v2667_v1 = vpop.f32.mrb[12].mxu0  ;;  %v3348_v61 = vsel %vm501_vm4, %v304_v56, 0 }
  0xfa   :  { %2682 = vmatmul.mubr.msk.bf16.vlgmr.msra.gmra.mrb[0].mxu1 %vm355_vm3, %v3199_v42  ;;  %2678 = vmatmul.mubr.msk.bf16.vlgmr.msra.gmra.mrb[16].mxu0 %vm355_vm3, %v3204_v43  ;;  %v243_v2 = vpop.f32.mrb[13].mxu0  ;;  %v252_v7 = vadd.f32 %v2667_v1, %v3180_v13  ;;  %v305_v1 = vld [vmem:[%s3745_s4 + $0x14] sm:$0xf] }
  0xfb   :  { %2685 = vmatprep.mubr.msk.bf16.mxu1 %vm3045_vm2, %v3044_v8  ;;  %2715 = vmatprep.mubr.msk.bf16.mxu0 %vm3045_vm2, %v3044_v8  ;;  %v2668_v3 = vpop.f32.mrb[14].mxu0  ;;  %v244_v9 = vadd.f32 %v3180_v13, %v243_v2 }
  0xfc   :  { %v246_v5 = vpop.f32.mrb[15].mxu0  ;;  %v255_v10 = vadd.f32 %v2668_v3, %v3180_v13  ;;  %2714 = vmatpush3.bf16.msra.mxu0 %v3291_v6  ;;  %v272_v12 = vmax.f32 %v252_v7, 0.0  ;;  %2750 = vmatpush3.bf16.msra.mxu1 %v3307_v20  ;;  %v3359_v7 = vsel %vm501_vm4, %v305_v1, 0 }
  0xfd   :  { %v247_v11 = vadd.f32 %v3180_v13, %v246_v5  ;;  %v270_v14 = vmax.f32 %v244_v9, 0.0  ;;  %2719 = vmatprep.subr.bf16.mxu0 %v3044_v8  ;;  %2761 = vmatprep.subr.bf16.mxu1 %v3044_v8 }
  0xfe   :  { %v273_v15 = vmax.f32 %v255_v10, 0.0  ;;  %v307_v10 = vld [vmem:[%s3745_s4 + $0x1c] sm:$0xf] }
  0xff   :  { %v271_v16 = vmax.f32 %v247_v11, 0.0  ;;  %v3373_v19 = vsel %vm501_vm4, %v307_v10, 0 }
 0x100   :  { %v3299_v17 = vpack.c.bf16 %v273_v15, %v272_v12  ;;  %v308_v12 = vld [vmem:[%s3745_s4 + $0x20] sm:$0xf] }
 0x101   :  { %v3301_v18 = vpack.c.bf16 %v271_v16, %v270_v14 }
 0x102   :  { %2686 = vmatmul.mubr.msk.bf16.gmra.mrb[4].mxu1 %vm355_vm3, %v3219_v44 }
 0x103   :  { %2689 = vmatprep.mubr.msk.bf16.mxu1 %vm3045_vm2, %v3044_v8 }
 0x10a   :  { %2690 = vmatmul.mubr.msk.bf16.gmra.mrb[8].mxu1 %vm355_vm3, %v3228_v45 }
 0x10b   :  { %2693 = vmatprep.mubr.msk.bf16.mxu1 %vm3045_vm2, %v3044_v8 }
 0x112   :  { %2694 = vmatmul.mubr.msk.bf16.gmra.mrb[12].mxu1 %vm355_vm3, %v3237_v46 }
 0x113   :  { %2697 = vmatprep.mubr.msk.bf16.mxu1 %vm3045_vm2, %v3044_v8 }
 0x11a   :  { %2698 = vmatmul.mubr.msk.bf16.gmra.mrb[16].mxu1 %vm355_vm3, %v3246_v47 }
 0x11b   :  { %2701 = vmatprep.mubr.msk.bf16.mxu1 %vm3045_vm2, %v3044_v8 }
 0x122   :  { %2702 = vmatmul.mubr.msk.bf16.gmra.mrb[20].mxu1 %vm355_vm3, %v3255_v48 }
 0x123   :  { %2705 = vmatprep.mubr.msk.bf16.mxu1 %vm3045_vm2, %v3044_v8 }
 0x12a   :  { %2706 = vmatmul.mubr.msk.bf16.gmra.mrb[24].mxu1 %vm355_vm3, %v3264_v49 }
 0x12b   :  { %2709 = vmatprep.mubr.msk.bf16.mxu1 %vm3045_vm2, %v3044_v8 }
 0x132   :  { %2710 = vmatmul.mubr.msk.bf16.gmra.mrb[28].mxu1 %vm355_vm3, %v3273_v50 }
 0x133   :  { %2751 = vmatprep.mubr.msk.bf16.mxu1 %vm3045_vm2, %v3044_v8 }
 0x1cd   :  { %v425_v13 = vpop.f32.mrb[0].mxu1  ;;  %v417_v21 = vpop.f32.mrb[16].mxu0 }
 0x1ce   :  { %v2683_v23 = vpop.f32.mrb[1].mxu1  ;;  %v2679_v24 = vpop.f32.mrb[17].mxu0 }
 0x1cf   :  { %v428_v25 = vpop.f32.mrb[2].mxu1  ;;  %v420_v26 = vpop.f32.mrb[18].mxu0 }
 0x1d0   :  { %v489_v27 = vpack.c.bf16 %v428_v25, %v425_v13  ;;  %v2684_v28 = vpop.f32.mrb[3].mxu1  ;;  %v488_v29 = vpack.c.bf16 %v420_v26, %v417_v21  ;;  %v2680_v31 = vpop.f32.mrb[19].mxu0  ;;  %v3376_v13 = vsel %vm501_vm4, %v308_v12, 0  ;;  %vm1036_vm4 = vcmask 910080  }
 0x1d2   :  { %2716 = vmatmul.mubr.msk.bf16.vlgmr.msra.gmra.mrb[20].mxu0 %vm497_vm5, %v489_v27 }
 0x1d3   :  { %2720 = vmatpush3.bf16.msra.mxu0 %v3315_v30  ;;  %2721 = vmatprep.mubr.msk.bf16.mxu0 %vm3045_vm2, %v3044_v8 }
 0x1d4   :  { %2725 = vmatprep.subr.bf16.mxu0 %v3044_v8 }
 0x1d5   :  { %v433_v32 = vpop.f32.mrb[4].mxu1 }
 0x1d6   :  { %v2687_v34 = vpop.f32.mrb[5].mxu1 }
 0x1d7   :  { %v436_v35 = vpop.f32.mrb[6].mxu1 }
 0x1d8   :  { %v490_v36 = vpack.c.bf16 %v436_v35, %v433_v32  ;;  %v2688_v37 = vpop.f32.mrb[7].mxu1 }
 0x1da   :  { %2722 = vmatmul.mubr.msk.bf16.vlgmr.msra.gmra.mrb[24].mxu0 %vm497_vm5, %v488_v29 }
 0x1db   :  { %2726 = vmatpush3.bf16.msra.mxu0 %v3326_v38  ;;  %2727 = vmatprep.mubr.msk.bf16.mxu0 %vm3045_vm2, %v3044_v8 }
 0x1dc   :  { %2731 = vmatprep.subr.bf16.mxu0 %v3044_v8 }
 0x1dd   :  { %v441_v39 = vpop.f32.mrb[8].mxu1 }
 0x1de   :  { %v2691_v41 = vpop.f32.mrb[9].mxu1 }
 0x1df   :  { %v444_v51 = vpop.f32.mrb[10].mxu1 }
 0x1e0   :  { %v491_v52 = vpack.c.bf16 %v444_v51, %v441_v39  ;;  %v2692_v53 = vpop.f32.mrb[11].mxu1 }
 0x1e2   :  { %2728 = vmatmul.mubr.msk.bf16.vlgmr.msra.gmra.mrb[28].mxu0 %vm497_vm5, %v490_v36 }
 0x1e3   :  { %2732 = vmatpush3.bf16.msra.mxu0 %v3337_v54  ;;  %2733 = vmatprep.mubr.msk.bf16.mxu0 %vm3045_vm2, %v3044_v8 }
 0x1e4   :  { %2737 = vmatprep.subr.bf16.mxu0 %v3044_v8 }
 0x1e5   :  { %v449_v55 = vpop.f32.mrb[12].mxu1 }
 0x1e6   :  { %v2695_v57 = vpop.f32.mrb[13].mxu1 }
 0x1e7   :  { %v452_v58 = vpop.f32.mrb[14].mxu1 }
 0x1e8   :  { %v492_v59 = vpack.c.bf16 %v452_v58, %v449_v55  ;;  %v2696_v60 = vpop.f32.mrb[15].mxu1 }
 0x1ea   :  { %2734 = vmatmul.mubr.msk.bf16.vlgmr.msra.gmra.mrb[32].mxu0 %vm497_vm5, %v491_v52 }
 0x1eb   :  { %2738 = vmatpush3.bf16.msra.mxu0 %v3348_v61  ;;  %2739 = vmatprep.mubr.msk.bf16.mxu0 %vm3045_vm2, %v3044_v8 }
 0x1ec   :  { %2743 = vmatprep.subr.bf16.mxu0 %v3044_v8 }
 0x1ed   :  { %v457_v62 = vpop.f32.mrb[16].mxu1 }
 0x1ee   :  { %v2699_v2 = vpop.f32.mrb[17].mxu1 }
 0x1ef   :  { %v460_v3 = vpop.f32.mrb[18].mxu1 }
 0x1f0   :  { %v493_v4 = vpack.c.bf16 %v460_v3, %v457_v62  ;;  %v2700_v5 = vpop.f32.mrb[19].mxu1 }
 0x1f2   :  { %2740 = vmatmul.mubr.msk.bf16.vlgmr.msra.gmra.mrb[36].mxu0 %vm497_vm5, %v492_v59 }
 0x1f3   :  { %2744 = vmatpush3.bf16.msra.mxu0 %v3359_v7  ;;  %2745 = vmatprep.mubr.msk.bf16.mxu0 %vm3045_vm2, %v3044_v8 }
 0x1f4   :  { %2755 = vmatprep.subr.bf16.mxu0 %v3044_v8 }
 0x1f5   :  { %v465_v9 = vpop.f32.mrb[20].mxu1 }
 0x1f6   :  { %v2703_v11 = vpop.f32.mrb[21].mxu1 }
 0x1f7   :  { %v468_v14 = vpop.f32.mrb[22].mxu1 }
 0x1f8   :  { %v494_v15 = vpack.c.bf16 %v468_v14, %v465_v9  ;;  %v2704_v16 = vpop.f32.mrb[23].mxu1 }
 0x1fa   :  { %2746 = vmatmul.mubr.msk.bf16.vlgmr.msra.gmra.mrb[40].mxu0 %vm497_vm5, %v493_v4  ;;  %2752 = vmatmul.mubr.msk.bf16.vlgmr.msra.gmra.mrb[32].mxu1 %vm497_vm5, %v494_v15 }
 0x1fb   :  { %2756 = vmatpush3.bf16.msra.mxu0 %v3373_v19  ;;  %2757 = vmatprep.mubr.msk.bf16.mxu0 %vm3045_vm2, %v3044_v8 }
 0x1fc   :  { %2767 = vmatprep.subr.bf16.mxu0 %v3044_v8  ;;  %2762 = vmatpush3.bf16.msra.mxu1 %v3376_v13 }
 0x1fd   :  { %v473_v21 = vpop.f32.mrb[24].mxu1  ;;  %2763 = vmatprep.mubr.msk.bf16.mxu1 %vm3045_vm2, %v3044_v8  ;;  %2811 = vmatprep.subr.bf16.mxu1 %v3044_v8 }
 0x1fe   :  { %v2707_v22 = vpop.f32.mrb[25].mxu1 }
 0x1ff   :  { %v476_v23 = vpop.f32.mrb[26].mxu1  ;;  %v3046_v22 = vmov 1966171168  }
 0x200   :  { %v495_v24 = vpack.c.bf16 %v476_v23, %v473_v21  ;;  %v2708_v25 = vpop.f32.mrb[27].mxu1  ;;  %v955_v23 = vunpack.c.l.s4 %v3046_v22 }
 0x201   :  { %v3440_v25 = vld [vmem:[%s3746_s5] ss:$0 sm:$0xff]  ;;  %s3047_s5 = smov 32  }
 0x202   :  { %2758 = vmatmul.mubr.msk.bf16.vlgmr.msra.gmra.mrb[44].mxu0 %vm497_vm5, %v495_v24  ;;  %v957_v24 = vlaneseq }
 0x203   :  { %2768 = vmatpush3.bf16.msra.mxu0 %v3285_v0  ;;  %2775 = vmatprep.mubr.msk.bf16.mxu0 %vm3045_vm2, %v3044_v8 }
 0x204   :  { %2769 = vmatprep.subr.bf16.mxu0 %v3044_v8 }
 0x205   :  { %v481_v26 = vpop.f32.mrb[28].mxu1 }
 0x206   :  { %v2711_v27 = vpop.f32.mrb[29].mxu1 }
 0x207   :  { %2770 = vmatpush3.bf16.msra.mxu0 %v3283_v63  ;;  %v484_v28 = vpop.f32.mrb[30].mxu1 }
 0x208   :  { %v496_v29 = vpack.c.bf16 %v484_v28, %v481_v26  ;;  %2771 = vmatprep.subr.bf16.mxu0 %v3044_v8  ;;  %v2712_v31 = vpop.f32.mrb[31].mxu1 }
 0x20a   :  { %2764 = vmatmul.mubr.msk.bf16.vlgmr.msra.gmra.mrb[36].mxu1 %vm497_vm5, %v496_v29 }
 0x20b   :  { %2772 = vmatpush3.bf16.msra.mxu0 %v3301_v18  ;;  %2812 = vmatpush3.bf16.msra.mxu1 %v3291_v6 }
 0x20c   :  { %2773 = vmatprep.subr.bf16.mxu0 %v3044_v8  ;;  %2813 = vmatprep.mubr.msk.bf16.mxu1 %vm3045_vm2, %v3044_v8 }
 0x20d   :  { %2817 = vmatprep.subr.bf16.mxu1 %v3044_v8 }
 0x20f   :  { %2774 = vmatpush3.bf16.msra.mxu0 %v3299_v17 }
 0x212   :  { %2776 = vmatmul.mubr.msk.bf16.vlgmr.msra.gmra.mrb[48].mxu0 %vm355_vm3, %v3204_v43 }
 0x213   :  { %2779 = vmatprep.mubr.msk.bf16.mxu0 %vm3045_vm2, %v3044_v8 }
 0x21a   :  { %2780 = vmatmul.mubr.msk.bf16.gmra.mrb[52].mxu0 %vm355_vm3, %v3199_v42 }
 0x21b   :  { %2783 = vmatprep.mubr.msk.bf16.mxu0 %vm3045_vm2, %v3044_v8 }
 0x222   :  { %2784 = vmatmul.mubr.msk.bf16.gmra.mrb[56].mxu0 %vm355_vm3, %v3219_v44 }
 0x223   :  { %2787 = vmatprep.mubr.msk.bf16.mxu0 %vm3045_vm2, %v3044_v8 }
 0x22a   :  { %2788 = vmatmul.mubr.msk.bf16.gmra.mrb[60].mxu0 %vm355_vm3, %v3228_v45 }
 0x22b   :  { %2791 = vmatprep.mubr.msk.bf16.mxu0 %vm3045_vm2, %v3044_v8 }
 0x232   :  { %2792 = vmatmul.mubr.msk.bf16.gmra.mrb[64].mxu0 %vm355_vm3, %v3237_v46 }
 0x233   :  { %2795 = vmatprep.mubr.msk.bf16.mxu0 %vm3045_vm2, %v3044_v8 }
 0x23a   :  { %2796 = vmatmul.mubr.msk.bf16.gmra.mrb[68].mxu0 %vm355_vm3, %v3246_v47 }
 0x23b   :  { %2799 = vmatprep.mubr.msk.bf16.mxu0 %vm3045_vm2, %v3044_v8 }
 0x242   :  { %2800 = vmatmul.mubr.msk.bf16.gmra.mrb[72].mxu0 %vm355_vm3, %v3255_v48 }
 0x243   :  { %2803 = vmatprep.mubr.msk.bf16.mxu0 %vm3045_vm2, %v3044_v8 }
 0x24a   :  { %2804 = vmatmul.mubr.msk.bf16.gmra.mrb[76].mxu0 %vm355_vm3, %v3264_v49 }
 0x24b   :  { %2807 = vmatprep.mubr.msk.bf16.mxu0 %vm3045_vm2, %v3044_v8 }
 0x252   :  { %2808 = vmatmul.mubr.msk.bf16.gmra.mrb[80].mxu0 %vm355_vm3, %v3273_v50  ;;  %vm1028_vm3 = vmand %vm1027_vm1, %vm948_vm7 }
 0x2a5   :  { %v539_v42 = vpop.f32.mrb[20].mxu0 }
 0x2a6   :  { %v2717_v43 = vpop.f32.mrb[21].mxu0 }
 0x2a7   :  { %v542_v44 = vpop.f32.mrb[22].mxu0  ;;  %v956_v43 = vunpack.c.0.s8 %v955_v23 }
 0x2a8   :  { %v2718_v45 = vpop.f32.mrb[23].mxu0 }
 0x2ad   :  { %v586_v46 = vpop.f32.mrb[24].mxu0 }
 0x2ae   :  { %v587_v47 = vadd.f32 %v586_v46, %v539_v42  ;;  %v2723_v63 = vpop.f32.mrb[25].mxu0 }
 0x2af   :  { %v589_v48 = vpop.f32.mrb[26].mxu0 }
 0x2b0   :  { %v590_v0 = vadd.f32 %v589_v48, %v542_v44  ;;  %v2724_v6 = vpop.f32.mrb[27].mxu0  ;;  %v958_v44 = vshrl.u32 %v957_v24, 7 }
 0x2b1   :  { %v950_v6 = vld [vmem:[#allocation2] sm:$0x1] }
 0x2b2   :  { %v3444_v48 = vsub.s32 %v956_v43, %v958_v44 }
 0x2b5   :  { %v633_v17 = vpop.f32.mrb[28].mxu0 }
 0x2b6   :  { %v640_v18 = vadd.f32 %v633_v17, %v587_v47  ;;  %v2729_v32 = vpop.f32.mrb[29].mxu0 }
 0x2b7   :  { %v636_v49 = vpop.f32.mrb[30].mxu0 }
 0x2b8   :  { %v641_v33 = vadd.f32 %v636_v49, %v590_v0  ;;  %v2730_v34 = vpop.f32.mrb[31].mxu0 }
 0x2bd   :  { %v682_v35 = vpop.f32.mrb[32].mxu0 }
 0x2be   :  { %v689_v36 = vadd.f32 %v682_v35, %v640_v18  ;;  %v2735_v37 = vpop.f32.mrb[33].mxu0 }
 0x2bf   :  { %v685_v50 = vpop.f32.mrb[34].mxu0 }
 0x2c0   :  { %v690_v39 = vadd.f32 %v685_v50, %v641_v33  ;;  %v2736_v40 = vpop.f32.mrb[35].mxu0 }
 0x2c5   :  { %v731_v41 = vpop.f32.mrb[36].mxu0 }
 0x2c6   :  { %v738_v51 = vadd.f32 %v731_v41, %v689_v36  ;;  %v2741_v52 = vpop.f32.mrb[37].mxu0 }
 0x2c7   :  { %v734_v53 = vpop.f32.mrb[38].mxu0 }
 0x2c8   :  { %v739_v55 = vadd.f32 %v734_v53, %v690_v39  ;;  %v2742_v56 = vpop.f32.mrb[39].mxu0 }
 0x2cd   :  { %v780_v57 = vpop.f32.mrb[40].mxu0  ;;  %v829_v58 = vpop.f32.mrb[32].mxu1 }
 0x2ce   :  { %v787_v59 = vadd.f32 %v780_v57, %v738_v51  ;;  %v2747_v60 = vpop.f32.mrb[41].mxu0  ;;  %v2753_v62 = vpop.f32.mrb[33].mxu1  ;;  %v1070_v51 = vld [vmem:[#allocation2 + $0x1] sm:$0x1] }
 0x2cf   :  { %v783_v1 = vpop.f32.mrb[42].mxu0  ;;  %v832_v2 = vpop.f32.mrb[34].mxu1 }
 0x2d0   :  { %v788_v3 = vadd.f32 %v783_v1, %v739_v55  ;;  %v836_v4 = vadd.f32 %v829_v58, %v787_v59  ;;  %v2748_v5 = vpop.f32.mrb[43].mxu0  ;;  %v2754_v9 = vpop.f32.mrb[35].mxu1 }
 0x2d2   :  { %v837_v10 = vadd.f32 %v832_v2, %v788_v3 }
 0x2d5   :  { %v878_v11 = vpop.f32.mrb[44].mxu0 }
 0x2d6   :  { %v885_v12 = vadd.f32 %v878_v11, %v836_v4  ;;  %v2759_v14 = vpop.f32.mrb[45].mxu0 }
 0x2d7   :  { %v881_v15 = vpop.f32.mrb[46].mxu0 }
 0x2d8   :  { %v886_v16 = vadd.f32 %v881_v15, %v837_v10  ;;  %v2760_v21 = vpop.f32.mrb[47].mxu0 }
 0x2dd   :  { %v927_v26 = vpop.f32.mrb[36].mxu1 }
 0x2de   :  { %v934_v27 = vadd.f32 %v927_v26, %v885_v12  ;;  %v2765_v28 = vpop.f32.mrb[37].mxu1 }
 0x2df   :  { %v930_v29 = vpop.f32.mrb[38].mxu1 }
 0x2e0   :  { %v942_v31 = vadd.f32 %v3440_v25, %v934_v27  ;;  %v935_v42 = vadd.f32 %v930_v29, %v886_v16  ;;  %v2766_v45 = vpop.f32.mrb[39].mxu1 }
 0x2e2   :  { %v943_v46 = vadd.f32 %v3440_v25, %v935_v42  ;;  %v944_v47 = vmax.f32 %v942_v31, 0.0 }
 0x2e4   :  { %v945_v63 = vmax.f32 %v943_v46, 0.0 }
 0x2e5   :  { %v1179_v17 = vpop.f32.mrb[48].mxu0 }
 0x2e6   :  { %v946_v18 = vpack.c.bf16 %v945_v63, %v944_v47  ;;  %v2456_v32 = vpack.c.bf16 %v945_v63, %v945_v63  ;;  %v2777_v49 = vpop.f32.mrb[49].mxu0 }
 0x2e7   :  { %v1182_v33 = vpop.f32.mrb[50].mxu0 }
 0x2e8   :  { %v951_v34 = vsel %vm3448_vm8, %v946_v18, %v950_v6  ;;  %v960_v35 = vrot.slane %v946_v18, %v3444_v48  ;;  %v1061_v36 = vrot.slane %v2456_v32, %v3444_v48  ;;  %v1250_v37 = vpack.c.bf16 %v1182_v33, %v1179_v17  ;;  %v2778_v50 = vpop.f32.mrb[51].mxu0 }
 0x2e9   :  { %952 = vst [vmem:[#allocation2] sm:$0x1] %v951_v34 }
 0x2ea   :  { %v981_v39 = vcombine.high %v960_v35, %v960_v35  ;;  %v967_v40 = vrot.slane %v960_v35, %v3444_v48  ;;  %v1068_v41 = vrot.slane %v1061_v36, %v3444_v48  ;;  %v1084_v55 = vcombine.high %v1061_v36, %v1061_v36 }
 0x2ec   :  { %v988_v52 = vrot.slane %v981_v39, %v3444_v48  ;;  %v969_v53 = vshrl.u32 %v967_v40, 16  ;;  %v1071_v57 = vsel %vm3448_vm8, %v1068_v41, %v1070_v51  ;;  %v1091_v62 = vrot.slane %v1084_v55, %v3444_v48 }
 0x2ed   :  { %v1187_v56 = vpop.f32.mrb[52].mxu0  ;;  %1072 = vst [vmem:[#allocation2 + $0x1] sm:$0x1] %v1071_v57  ;;  %v1074_v2 = vshrl.u32 %v1068_v41, 16  ;;  %v1109_v11 = vcombine.high %v1068_v41, %v1068_v41  ;;  %v1010_v15 = vcombine.high %v967_v40, %v967_v40  ;;  %vm1049_vm8 = vcmask 1041280  }
 0x2ee   :  { %v2781_v58 = vpop.f32.mrb[53].mxu0  ;;  %989 = vrot.lane.b32.xlu1 %v988_v52, %s3047_s5  ;;  %973 = vrot.lane.b32.xlu0 %v969_v53, %s3048_s18  ;;  %v1099_v3 = vshrl.u32 %v1091_v62, 16  ;;  %v998_v4 = vshrl.u32 %v988_v52, 16  ;;  %v1127_v24 = vcombine.high %v1091_v62, %v1091_v62  ;;  %v1032_v28 = vcombine.high %v988_v52, %v988_v52 }
 0x2ef   :  { %v1190_v59 = vpop.f32.mrb[54].mxu0  ;;  %v1020_v16 = vshrl.u32 %v1010_v15, 16 }
 0x2f0   :  { %v1251_v60 = vpack.c.bf16 %v1190_v59, %v1187_v56  ;;  %v2782_v1 = vpop.f32.mrb[55].mxu0  ;;  %v1042_v29 = vshrl.u32 %v1032_v28, 16  ;;  %v978_v40 = vld [vmem:[#allocation2] sm:$0x1] }
 0x2f2   :  { %2814 = vmatmul.mubr.msk.bf16.vlgmr.msra.gmra.mrb[40].mxu1 %vm497_vm5, %v1251_v60  ;;  %1092 = vrot.lane.b32.xlu1 %v1091_v62, %s3047_s5 }
 0x2f3   :  { %1078 = vrot.lane.b32.xlu0 %v1074_v2, %s3048_s18  ;;  %2818 = vmatpush3.bf16.msra.mxu1 %v3315_v30  ;;  %v1117_v30 = vshrl.u32 %v1109_v11, 16 }
 0x2f4   :  { %2819 = vmatprep.mubr.msk.bf16.mxu1 %vm3045_vm2, %v3044_v8  ;;  %2823 = vmatprep.subr.bf16.mxu1 %v3044_v8 }
 0x2f5   :  { %v1195_v5 = vpop.f32.mrb[56].mxu0 }
 0x2f6   :  { %1103 = vrot.lane.b32.xlu1 %v1099_v3, %s3049_s3  ;;  %v2785_v9 = vpop.f32.mrb[57].mxu0 }
 0x2f7   :  { %1002 = vrot.lane.b32.xlu0 %v998_v4, %s3049_s3  ;;  %v1198_v10 = vpop.f32.mrb[58].mxu0 }
 0x2f8   :  { %v1252_v12 = vpack.c.bf16 %v1198_v10, %v1195_v5  ;;  %v2786_v14 = vpop.f32.mrb[59].mxu0 }
 0x2fa   :  { %2820 = vmatmul.mubr.msk.bf16.vlgmr.msra.gmra.mrb[44].mxu1 %vm497_vm5, %v1250_v37  ;;  %1110 = vrot.lane.b32.xlu1 %v1109_v11, %s3050_s19 }
 0x2fb   :  { %1011 = vrot.lane.b32.xlu0 %v1010_v15, %s3050_s19  ;;  %2824 = vmatpush3.bf16.msra.mxu1 %v3326_v38  ;;  %v1135_v38 = vshrl.u32 %v1127_v24, 16 }
 0x2fc   :  { %2825 = vmatprep.mubr.msk.bf16.mxu1 %vm3045_vm2, %v3044_v8  ;;  %2829 = vmatprep.subr.bf16.mxu1 %v3044_v8 }
 0x2fd   :  { %v1203_v21 = vpop.f32.mrb[60].mxu0 }
 0x2fe   :  { %1121 = vrot.lane.b32.xlu1 %v1117_v30, %s3051_s0  ;;  %v2789_v22 = vpop.f32.mrb[61].mxu0 }
 0x2ff   :  { %1024 = vrot.lane.b32.xlu0 %v1020_v16, %s3051_s0  ;;  %v1206_v23 = vpop.f32.mrb[62].mxu0 }
 0x300   :  { %v1253_v26 = vpack.c.bf16 %v1206_v23, %v1203_v21  ;;  %v2790_v27 = vpop.f32.mrb[63].mxu0 }
 0x302   :  { %2826 = vmatmul.mubr.msk.bf16.vlgmr.msra.gmra.mrb[48].mxu1 %vm497_vm5, %v1252_v12  ;;  %1128 = vrot.lane.b32.xlu1 %v1127_v24, %s3052_s2 }
 0x303   :  { %1033 = vrot.lane.b32.xlu0 %v1032_v28, %s3052_s2  ;;  %2830 = vmatpush3.bf16.msra.mxu1 %v3337_v54 }
 0x304   :  { %2831 = vmatprep.mubr.msk.bf16.mxu1 %vm3045_vm2, %v3044_v8  ;;  %2835 = vmatprep.subr.bf16.mxu1 %v3044_v8 }
 0x305   :  { %v1211_v31 = vpop.f32.mrb[64].mxu0 }
 0x306   :  { %1139 = vrot.lane.b32.xlu1 %v1135_v38, %s3053_s20  ;;  %v2793_v42 = vpop.f32.mrb[65].mxu0 }
 0x307   :  { %1046 = vrot.lane.b32.xlu0 %v1042_v29, %s3053_s20  ;;  %v1214_v43 = vpop.f32.mrb[66].mxu0 }
 0x308   :  { %v1254_v44 = vpack.c.bf16 %v1214_v43, %v1211_v31  ;;  %v2794_v45 = vpop.f32.mrb[67].mxu0 }
 0x30a   :  { %2832 = vmatmul.mubr.msk.bf16.vlgmr.msra.gmra.mrb[52].mxu1 %vm497_vm5, %v1253_v26 }
 0x30b   :  { %2836 = vmatpush3.bf16.msra.mxu1 %v3348_v61  ;;  %2837 = vmatprep.mubr.msk.bf16.mxu1 %vm3045_vm2, %v3044_v8 }
 0x30c   :  { %2841 = vmatprep.subr.bf16.mxu1 %v3044_v8 }
 0x30d   :  { %v1219_v54 = vpop.f32.mrb[68].mxu0 }
 0x30e   :  { %v2797_v46 = vpop.f32.mrb[69].mxu0 }
 0x30f   :  { %v1222_v47 = vpop.f32.mrb[70].mxu0 }
 0x310   :  { %v1255_v63 = vpack.c.bf16 %v1222_v47, %v1219_v54  ;;  %v2798_v0 = vpop.f32.mrb[71].mxu0 }
 0x312   :  { %2838 = vmatmul.mubr.msk.bf16.vlgmr.msra.gmra.mrb[56].mxu1 %vm497_vm5, %v1254_v44 }
 0x313   :  { %2842 = vmatpush3.bf16.msra.mxu1 %v3359_v7  ;;  %2843 = vmatprep.mubr.msk.bf16.mxu1 %vm3045_vm2, %v3044_v8 }
 0x314   :  { %2847 = vmatprep.subr.bf16.mxu1 %v3044_v8 }
 0x315   :  { %v1227_v61 = vpop.f32.mrb[72].mxu0 }
 0x316   :  { %v2801_v6 = vpop.f32.mrb[73].mxu0 }
 0x317   :  { %v1230_v17 = vpop.f32.mrb[74].mxu0 }
 0x318   :  { %v1256_v18 = vpack.c.bf16 %v1230_v17, %v1227_v61  ;;  %v2802_v32 = vpop.f32.mrb[75].mxu0 }
 0x31a   :  { %2844 = vmatmul.mubr.msk.bf16.vlgmr.msra.gmra.mrb[60].mxu1 %vm497_vm5, %v1255_v63 }
 0x31b   :  { %2848 = vmatpush3.bf16.msra.mxu1 %v3307_v20  ;;  %2849 = vmatprep.mubr.msk.bf16.mxu1 %vm3045_vm2, %v3044_v8 }
 0x31c   :  { %2853 = vmatprep.subr.bf16.mxu1 %v3044_v8 }
 0x31d   :  { %v1235_v7 = vpop.f32.mrb[76].mxu0 }
 0x31e   :  { %v2805_v49 = vpop.f32.mrb[77].mxu0 }
 0x31f   :  { %v1238_v33 = vpop.f32.mrb[78].mxu0 }
 0x320   :  { %v1257_v34 = vpack.c.bf16 %v1238_v33, %v1235_v7  ;;  %v2806_v35 = vpop.f32.mrb[79].mxu0 }
 0x322   :  { %2850 = vmatmul.mubr.msk.bf16.vlgmr.msra.gmra.mrb[64].mxu1 %vm497_vm5, %v1256_v18 }
 0x323   :  { %2854 = vmatpush3.bf16.msra.mxu1 %v3373_v19  ;;  %2855 = vmatprep.mubr.msk.bf16.mxu1 %vm3045_vm2, %v3044_v8 }
 0x324   :  { %2859 = vmatprep.subr.bf16.mxu1 %v3044_v8 }
 0x325   :  { %v1243_v20 = vpop.f32.mrb[80].mxu0 }
 0x326   :  { %v2809_v36 = vpop.f32.mrb[81].mxu0 }
 0x327   :  { %v1246_v37 = vpop.f32.mrb[82].mxu0 }
 0x328   :  { %v1258_v50 = vpack.c.bf16 %v1246_v37, %v1243_v20  ;;  %v2810_v39 = vpop.f32.mrb[83].mxu0 }
 0x32a   :  { %2856 = vmatmul.mubr.msk.bf16.vlgmr.msra.gmra.mrb[68].mxu1 %vm497_vm5, %v1257_v34 }
 0x32b   :  { %2860 = vmatpush3.bf16.msra.mxu1 %v3376_v13  ;;  %2861 = vmatprep.mubr.msk.bf16.mxu1 %vm3045_vm2, %v3044_v8  ;;  %v1081_v13 = vld [vmem:[#allocation2 + $0x1] sm:$0x1] }
 0x32c   :  { %2865 = vmatprep.subr.bf16.mxu1 %v3044_v8 }
 0x332   :  { %2862 = vmatmul.mubr.msk.bf16.vlgmr.msra.gmra.mrb[72].mxu1 %vm497_vm5, %v1258_v50  ;;  %vm1037_vm5 = vmand %vm1036_vm4, %vm948_vm7 }
 0x333   :  { %2881 = vmatprep.mubr.msk.bf16.mxu1 %vm3045_vm2, %v3044_v8 }
 0x360   :  { %v974_v19 = vpop.permute.xlu0 %973  ;;  %v990_v53 = vpop.permute.xlu1 %989 }
 0x361   :  { %v979_v41 = vsel %vm977_vm10, %v974_v19, %v978_v40 }
 0x362   :  { %980 = vst [vmem:[#allocation2] sm:$0x1] %v979_v41 }
 0x364   :  { %v1093_v57 = vpop.permute.xlu1 %1092 }
 0x365   :  { %v1079_v51 = vpop.permute.xlu0 %1078 }
 0x366   :  { %v1082_v52 = vsel %vm977_vm10, %v1079_v51, %v1081_v13  ;;  %vm1050_vm10 = vmand %vm1049_vm8, %vm948_vm7  ;;  %vm1693_vm7 = vsmask.f32 7938 }
 0x367   :  { %1083 = vst [vmem:[#allocation2 + $0x1] sm:$0x1] %v1082_v52 }
 0x368   :  { %v1104_v3 = vpop.permute.xlu1 %1103 }
 0x369   :  { %v994_v55 = vld [vmem:[#allocation2] sm:$0x1]  ;;  %v1003_v62 = vpop.permute.xlu0 %1002 }
 0x36a   :  { %v995_v56 = vsel %vm993_vm12, %v990_v53, %v994_v55 }
 0x36b   :  { %996 = vst [vmem:[#allocation2] sm:$0x1] %v995_v56 }
 0x36c   :  { %v1111_v12 = vpop.permute.xlu1 %1110 }
 0x36d   :  { %v1012_v9 = vpop.permute.xlu0 %1011 }
 0x36e   :  { %v1095_v58 = vld [vmem:[#allocation2 + $0x1] sm:$0x1] }
 0x36f   :  { %v1096_v59 = vsel %vm993_vm12, %v1093_v57, %v1095_v58  ;;  %vm1694_vm12 = vmand %vm947_vm6, %vm1693_vm7 }
 0x370   :  { %1097 = vst [vmem:[#allocation2 + $0x1] sm:$0x1] %v1096_v59  ;;  %v1122_v21 = vpop.permute.xlu1 %1121  ;;  %vm1701_vm6 = vmand %vm976_vm9, %vm1693_vm7 }
 0x371   :  { %v1025_v15 = vpop.permute.xlu0 %1024  ;;  %vm1726_vm9 = vmand %vm1005_vm13, %vm1693_vm7 }
 0x372   :  { %v1007_v60 = vld [vmem:[#allocation2] sm:$0x1]  ;;  %vm1744_vm13 = vmand %vm1027_vm1, %vm1693_vm7 }
 0x373   :  { %v1008_v1 = vsel %vm1006_vm14, %v1003_v62, %v1007_v60 }
 0x374   :  { %1009 = vst [vmem:[#allocation2] sm:$0x1] %v1008_v1  ;;  %v1129_v28 = vpop.permute.xlu1 %1128 }
 0x375   :  { %v1034_v24 = vpop.permute.xlu0 %1033 }
 0x377   :  { %v1106_v2 = vld [vmem:[#allocation2 + $0x1] sm:$0x1] }
 0x378   :  { %v1107_v4 = vsel %vm1006_vm14, %v1104_v3, %v1106_v2  ;;  %v1140_v44 = vpop.permute.xlu1 %1139  ;;  %vm1719_vm14 = vmand %vm992_vm11, %vm1693_vm7 }
 0x379   :  { %1108 = vst [vmem:[#allocation2 + $0x1] sm:$0x1] %v1107_v4  ;;  %v1047_v31 = vpop.permute.xlu0 %1046  ;;  %vm1737_vm11 = vmand %vm1014_vm15, %vm1693_vm7 }
 0x37a   :  { %vm1755_vm15 = vmand %vm1036_vm4, %vm1693_vm7 }
 0x37b   :  { %v1016_v5 = vld [vmem:[#allocation2] sm:$0x1] }
 0x37c   :  { %v1017_v10 = vsel %vm1015_vm0, %v1012_v9, %v1016_v5 }
 0x37d   :  { %1018 = vst [vmem:[#allocation2] sm:$0x1] %v1017_v10 }
 0x380   :  { %v1113_v11 = vld [vmem:[#allocation2 + $0x1] sm:$0x1] }
 0x381   :  { %v1114_v14 = vsel %vm1015_vm0, %v1111_v12, %v1113_v11  ;;  %vm1762_vm0 = vmand %vm1049_vm8, %vm1693_vm7 }
 0x382   :  { %1115 = vst [vmem:[#allocation2 + $0x1] sm:$0x1] %v1114_v14 }
 0x384   :  { %v1029_v30 = vld [vmem:[#allocation2] sm:$0x1] }
 0x385   :  { %v1030_v16 = vsel %vm1028_vm3, %v1025_v15, %v1029_v30 }
 0x386   :  { %1031 = vst [vmem:[#allocation2] sm:$0x1] %v1030_v16 }
 0x389   :  { %v1124_v22 = vld [vmem:[#allocation2 + $0x1] sm:$0x1] }
 0x38a   :  { %v1125_v23 = vsel %vm1028_vm3, %v1122_v21, %v1124_v22 }
 0x38b   :  { %1126 = vst [vmem:[#allocation2 + $0x1] sm:$0x1] %v1125_v23 }
 0x38d   :  { %v1038_v26 = vld [vmem:[#allocation2] sm:$0x1] }
 0x38e   :  { %v1039_v27 = vsel %vm1037_vm5, %v1034_v24, %v1038_v26 }
 0x38f   :  { %1040 = vst [vmem:[#allocation2] sm:$0x1] %v1039_v27 }
 0x392   :  { %v1131_v38 = vld [vmem:[#allocation2 + $0x1] sm:$0x1] }
 0x393   :  { %v1132_v29 = vsel %vm1037_vm5, %v1129_v28, %v1131_v38 }
 0x394   :  { %1133 = vst [vmem:[#allocation2 + $0x1] sm:$0x1] %v1132_v29  ;;  %v2980_v29 = vld [vmem:[%s3747_s6 + $0x40] sm:$0xff]  }
 0x395   :  { %2598 = vmatprep.subr.bf16.mxu0 %v2980_v29 }
 0x396   :  { %v1051_v42 = vld [vmem:[#allocation2] sm:$0x1] }
 0x397   :  { %v1052_v43 = vsel %vm1050_vm10, %v1047_v31, %v1051_v42  ;;  %v2981_v31 = vld [vmem:[%s3747_s6] sm:$0xff]  }
 0x398   :  { %1053 = vst [vmem:[#allocation2] sm:$0x1] %v1052_v43  ;;  %2599 = vmatpush3.bf16.msra.mxu0 %v2981_v31 }
 0x39b   :  { %v1142_v45 = vld [vmem:[#allocation2 + $0x1] sm:$0x1] }
 0x39c   :  { %v1143_v54 = vsel %vm1050_vm10, %v1140_v44, %v1142_v45 }
 0x39d   :  { %1144 = vst [vmem:[#allocation2 + $0x1] sm:$0x1] %v1143_v54 }
 0x3c5   :  { %v1296_v46 = vpop.f32.mrb[40].mxu1 }
 0x3c6   :  { %v2815_v47 = vpop.f32.mrb[41].mxu1 }
 0x3c7   :  { %v1299_v63 = vpop.f32.mrb[42].mxu1 }
 0x3c8   :  { %v2816_v0 = vpop.f32.mrb[43].mxu1 }
 0x3cd   :  { %v1340_v61 = vpop.f32.mrb[44].mxu1 }
 0x3ce   :  { %v1341_v6 = vadd.f32 %v1340_v61, %v1296_v46  ;;  %v2821_v17 = vpop.f32.mrb[45].mxu1 }
 0x3cf   :  { %v1343_v18 = vpop.f32.mrb[46].mxu1 }
 0x3d0   :  { %v1344_v32 = vadd.f32 %v1343_v18, %v1299_v63  ;;  %v2822_v7 = vpop.f32.mrb[47].mxu1 }
 0x3d1   :  { %v1695_v7 = vld [vmem:[#allocation2] sm:$0x1] }
 0x3d5   :  { %v1384_v49 = vpop.f32.mrb[48].mxu1 }
 0x3d6   :  { %v1391_v33 = vadd.f32 %v1384_v49, %v1341_v6  ;;  %v2827_v34 = vpop.f32.mrb[49].mxu1 }
 0x3d7   :  { %v1387_v35 = vpop.f32.mrb[50].mxu1 }
 0x3d8   :  { %v1392_v20 = vadd.f32 %v1387_v35, %v1344_v32  ;;  %v2828_v36 = vpop.f32.mrb[51].mxu1  ;;  %v1785_v32 = vld [vmem:[#allocation2 + $0x1] sm:$0x1] }
 0x3dd   :  { %v1430_v37 = vpop.f32.mrb[52].mxu1 }
 0x3de   :  { %v1437_v50 = vadd.f32 %v1430_v37, %v1391_v33  ;;  %v2833_v39 = vpop.f32.mrb[53].mxu1 }
 0x3df   :  { %v1433_v19 = vpop.f32.mrb[54].mxu1 }
 0x3e0   :  { %v1438_v40 = vadd.f32 %v1433_v19, %v1392_v20  ;;  %v2834_v41 = vpop.f32.mrb[55].mxu1 }
 0x3e5   :  { %v1476_v13 = vpop.f32.mrb[56].mxu1 }
 0x3e6   :  { %v1483_v51 = vadd.f32 %v1476_v13, %v1437_v50  ;;  %v2839_v52 = vpop.f32.mrb[57].mxu1 }
 0x3e7   :  { %v1479_v53 = vpop.f32.mrb[58].mxu1 }
 0x3e8   :  { %v1484_v55 = vadd.f32 %v1479_v53, %v1438_v40  ;;  %v2840_v56 = vpop.f32.mrb[59].mxu1  ;;  %v2982_v53 = vld [vmem:[%s3747_s6 + $0x48] sm:$0xff]  }
 0x3e9   :  { %2600 = vmatprep.subr.bf16.mxu0 %v2982_v53  ;;  %v2984_v56 = vld [vmem:[%s3747_s6 + $0x50] sm:$0xff]  }
 0x3ed   :  { %v1522_v57 = vpop.f32.mrb[60].mxu1 }
 0x3ee   :  { %v1529_v58 = vadd.f32 %v1522_v57, %v1483_v51  ;;  %v2845_v59 = vpop.f32.mrb[61].mxu1  ;;  %v2985_v57 = vld [vmem:[%s3747_s6 + $0x10] sm:$0xff]  }
 0x3ef   :  { %v1525_v60 = vpop.f32.mrb[62].mxu1  ;;  %v2987_v59 = vld [vmem:[%s3747_s6 + $0x18] sm:$0xff]  }
 0x3f0   :  { %v1530_v62 = vadd.f32 %v1525_v60, %v1484_v55  ;;  %v2846_v1 = vpop.f32.mrb[63].mxu1  ;;  %v2983_v55 = vld [vmem:[%s3747_s6 + $0x8] sm:$0xff]   ;;  %v2988_v60 = vld [vmem:[%s3747_s6 + $0x60] sm:$0xff]  }
 0x3f1   :  { %2601 = vmatpush3.bf16.msra.mxu0 %v2983_v55  ;;  %v2990_v1 = vld [vmem:[%s3747_s6 + $0x68] sm:$0xff]  }
 0x3f2   :  { %2602 = vmatprep.subr.bf16.mxu0 %v2984_v56 }
 0x3f5   :  { %v1568_v2 = vpop.f32.mrb[64].mxu1  ;;  %2603 = vmatpush3.bf16.msra.mxu0 %v2985_v57 }
 0x3f6   :  { %v1575_v3 = vadd.f32 %v1568_v2, %v1529_v58  ;;  %v2851_v4 = vpop.f32.mrb[65].mxu1  ;;  %v2986_v58 = vld [vmem:[%s3747_s6 + $0x58] sm:$0xff]   ;;  %v2991_v2 = vld [vmem:[%s3747_s6 + $0x28] sm:$0xff]  }
 0x3f7   :  { %v1571_v5 = vpop.f32.mrb[66].mxu1  ;;  %2604 = vmatprep.subr.bf16.mxu0 %v2986_v58  ;;  %v2993_v4 = vld [vmem:[%s3747_s6 + $0x30] sm:$0xff]  }
 0x3f8   :  { %v1576_v9 = vadd.f32 %v1571_v5, %v1530_v62  ;;  %v2852_v10 = vpop.f32.mrb[67].mxu1  ;;  %v2989_v62 = vld [vmem:[%s3747_s6 + $0x20] sm:$0xff]   ;;  %v2994_v5 = vld [vmem:[%s3747_s6 + $0x78] sm:$0xff]  }
 0x3f9   :  { %2605 = vmatpush3.bf16.msra.mxu0 %v2987_v59  ;;  %v2996_v10 = vld [vmem:[%s3749_s8] sm:$0xff]  }
 0x3fa   :  { %2606 = vmatprep.subr.bf16.mxu0 %v2988_v60  ;;  %2866 = vmatpush3.bf16.msra.mxu1 %v2996_v10 }
 0x3fb   :  { %2867 = vmatprep.subr.bf16.mxu1 %v3044_v8 }
 0x3fd   :  { %v1614_v11 = vpop.f32.mrb[68].mxu1  ;;  %2607 = vmatpush3.bf16.msra.mxu0 %v2989_v62  ;;  %v3002_v62 = vld [vmem:[%s3749_s8 + $0x30] sm:$0xff]  }
 0x3fe   :  { %v1621_v12 = vadd.f32 %v1614_v11, %v1575_v3  ;;  %v2857_v14 = vpop.f32.mrb[69].mxu1  ;;  %v2992_v3 = vld [vmem:[%s3747_s6 + $0x70] sm:$0xff]   ;;  %2608 = vmatprep.subr.bf16.mxu0 %v2990_v1  ;;  %v2997_v11 = vld [vmem:[%s3749_s8 + $0x8] sm:$0xff]   ;;  %v3003_v1 = vld [vmem:[%s3749_s8 + $0x38] sm:$0xff]  }
 0x3ff   :  { %v1617_v15 = vpop.f32.mrb[70].mxu1  ;;  %2868 = vmatpush3.bf16.msra.mxu1 %v2997_v11  ;;  %v2999_v14 = vld [vmem:[%s3749_s8 + $0x18] sm:$0xff]   ;;  %v2480_v11 = vld [vmem:[%s3748_s7] ss:$0 sm:$0xff] }
 0x400   :  { %v1622_v30 = vadd.f32 %v1617_v15, %v1576_v9  ;;  %v2858_v16 = vpop.f32.mrb[71].mxu1  ;;  %v2995_v9 = vld [vmem:[%s3747_s6 + $0x38] sm:$0xff]   ;;  %2869 = vmatprep.subr.bf16.mxu1 %v3044_v8  ;;  %v3000_v15 = vld [vmem:[%s3749_s8 + $0x20] sm:$0xff]  }
 0x401   :  { %2609 = vmatpush3.bf16.msra.mxu0 %v2991_v2  ;;  %v3005_v2 = vld [vmem:[%s3751_s10 + $0x8] sm:$0xff]  }
 0x402   :  { %2610 = vmatprep.subr.bf16.mxu0 %v2992_v3  ;;  %v3006_v3 = vld [vmem:[%s3751_s10 + $0x10] sm:$0xff]  }
 0x405   :  { %v1660_v21 = vpop.f32.mrb[72].mxu1  ;;  %2611 = vmatpush3.bf16.msra.mxu0 %v2993_v4  ;;  %v3007_v4 = vld [vmem:[%s3751_s10 + $0x18] sm:$0xff]  }
 0x406   :  { %v1667_v22 = vadd.f32 %v1660_v21, %v1621_v12  ;;  %v2863_v23 = vpop.f32.mrb[73].mxu1  ;;  %2612 = vmatprep.subr.bf16.mxu0 %v2994_v5  ;;  %v2998_v12 = vld [vmem:[%s3749_s8 + $0x10] sm:$0xff]   ;;  %v3008_v5 = vld [vmem:[%s3751_s10 + $0x20] sm:$0xff]  }
 0x407   :  { %v1663_v24 = vpop.f32.mrb[74].mxu1  ;;  %2870 = vmatpush3.bf16.msra.mxu1 %v2998_v12 }
 0x408   :  { %v1669_v26 = vadd.f32 %v3440_v25, %v1667_v22  ;;  %v1668_v27 = vadd.f32 %v1663_v24, %v1622_v30  ;;  %v2864_v28 = vpop.f32.mrb[75].mxu1  ;;  %2871 = vmatprep.subr.bf16.mxu1 %v3044_v8  ;;  %v3001_v30 = vld [vmem:[%s3749_s8 + $0x28] sm:$0xff]  }
 0x409   :  { %2613 = vmatpush3.bf16.msra.mxu0 %v2995_v9  ;;  %v3009_v9 = vld [vmem:[%s3751_s10 + $0x28] sm:$0xff]  }
 0x40a   :  { %v1670_v38 = vadd.f32 %v3440_v25, %v1668_v27  ;;  %v1671_v42 = vmax.f32 %v1669_v26, 0.0  ;;  %2885 = vmatprep.subr.bf16.mxu0 %v3044_v8 }
 0x40b   :  { %2872 = vmatpush3.bf16.msra.mxu1 %v2999_v14 }
 0x40c   :  { %v1672_v43 = vmax.f32 %v1670_v38, 0.0  ;;  %2873 = vmatprep.subr.bf16.mxu1 %v3044_v8 }
 0x40e   :  { %v1673_v44 = vpack.c.bf16 %v1672_v43, %v1671_v42  ;;  %v2479_v45 = vpack.c.bf16 %v1672_v43, %v1672_v43 }
 0x40f   :  { %2874 = vmatpush3.bf16.msra.mxu1 %v3000_v15 }
 0x410   :  { %v1773_v54 = vrot.slane %v2479_v45, %v3444_v48  ;;  %v1681_v46 = vrot.slane %v1673_v44, %v3444_v48  ;;  %2875 = vmatprep.subr.bf16.mxu1 %v3044_v8 }
 0x412   :  { %v1780_v25 = vrot.slane %v1773_v54, %v3444_v48  ;;  %v1794_v47 = vcombine.high %v1773_v54, %v1773_v54  ;;  %v1688_v63 = vrot.slane %v1681_v46, %v3444_v48  ;;  %v1705_v0 = vcombine.high %v1681_v46, %v1681_v46 }
 0x413   :  { %2876 = vmatpush3.bf16.msra.mxu1 %v3001_v30 }
 0x414   :  { %v1801_v61 = vrot.slane %v1794_v47, %v3444_v48  ;;  %1788 = vrot.lane.b32.xlu1 %v1780_v25, %s3048_s18  ;;  %v1782_v6 = vshll.u32 %v1780_v25, 16  ;;  %1698 = vrot.lane.b32.xlu0 %v1688_v63, %s3048_s18  ;;  %v1690_v17 = vshll.u32 %v1688_v63, 16  ;;  %v1712_v18 = vrot.slane %v1705_v0, %v3444_v48 }
 0x415   :  { %v1730_v49 = vcombine.high %v1688_v63, %v1688_v63  ;;  %v1817_v33 = vcombine.high %v1780_v25, %v1780_v25  ;;  %2877 = vmatprep.subr.bf16.mxu1 %v3044_v8 }
 0x416   :  { %v1786_v34 = vsel %vm1694_vm12, %v1782_v6, %v1785_v32  ;;  %v1696_v35 = vsel %vm1694_vm12, %v1690_v17, %v1695_v7  ;;  %v1714_v20 = vshll.u32 %v1712_v18, 16  ;;  %v1803_v36 = vshll.u32 %v1801_v61, 16 }
 0x417   :  { %1787 = vst [vmem:[#allocation2 + $0x1] sm:$0x1] %v1786_v34  ;;  %1697 = vst [vmem:[#allocation2] sm:$0x1] %v1696_v35  ;;  %v1732_v37 = vshll.u32 %v1730_v49, 16  ;;  %v1819_v50 = vshll.u32 %v1817_v33, 16  ;;  %v1748_v39 = vcombine.high %v1712_v18, %v1712_v18  ;;  %v1833_v19 = vcombine.high %v1801_v61, %v1801_v61  ;;  %2878 = vmatpush3.bf16.msra.mxu1 %v3002_v62 }
 0x418   :  { %1723 = vrot.lane.b32.xlu1 %v1712_v18, %s3049_s3  ;;  %v2945_v40 = vpack.i.bf16 %v1803_v36, %v1714_v20  ;;  %2879 = vmatprep.subr.bf16.mxu1 %v3044_v8 }
 0x419   :  { %v2950_v41 = vpack.i.bf16 %v1819_v50, %v1732_v37  ;;  %v1750_v13 = vshll.u32 %v1748_v39, 16  ;;  %v1835_v51 = vshll.u32 %v1833_v19, 16 }
 0x41a   :  { %2946 = vrot.lane.b32.xlu0 %v2945_v40, %s3047_s5  ;;  %s3054_s5 = smov [#allocation3]  }
 0x41b   :  { %v2955_v52 = vpack.i.bf16 %v1835_v51, %v1750_v13  ;;  %2880 = vmatpush3.bf16.msra.mxu1 %v3003_v1  ;;  %s2396_s6 = sshll.u32 %s3054_s5, 4  ;;  %s2397_s6 = int_to_ptr.vmem [resolvable:$true] %s2396_s6 }
 0x41c   :  { %2951 = vrot.lane.b32.xlu1 %v2950_v41, %s3050_s19  ;;  %2905 = vmatprep.subr.bf16.mxu1 %v3044_v8  ;;  %p3025_p1 = scmp.lt.s32.totalorder %s2397_s6, %s2397_s6 }
 0x41e   :  { %1811 = vrot.lane.b32.xlu0 %v1801_v61, %s3049_s3  ;;  %v1791_v21 = vld [vmem:[#allocation2 + $0x1] sm:$0x1]  ;;  %v1702_v23 = vld [vmem:[#allocation2] sm:$0x1] }
 0x420   :  { %1827 = vrot.lane.b32.xlu1 %v1817_v33, %s3051_s0 }
 0x422   :  { %1741 = vrot.lane.b32.xlu0 %v1730_v49, %s3051_s0 }
 0x424   :  { %1759 = vrot.lane.b32.xlu1 %v1748_v39, %s3053_s20 }
 0x426   :  { %2956 = vrot.lane.b32.xlu0 %v2955_v52, %s3052_s2 }
 0x42a   :  { %1843 = vrot.lane.b32.xlu0 %v1833_v19, %s3053_s20 }
 0x486   :  { %v1789_v16 = vpop.permute.xlu1 %1788  ;;  %v1699_v22 = vpop.permute.xlu0 %1698 }
 0x487   :  { %v1792_v24 = vsel %vm1701_vm6, %v1789_v16, %v1791_v21  ;;  %v1703_v26 = vsel %vm1701_vm6, %v1699_v22, %v1702_v23  ;;  %v3010_v23 = vld [vmem:[%s3751_s10 + $0x30] sm:$0xff]  }
 0x488   :  { %1793 = vst [vmem:[#allocation2 + $0x1] sm:$0x1] %v1792_v24  ;;  %1704 = vst [vmem:[#allocation2] sm:$0x1] %v1703_v26  ;;  %v3011_v24 = vld [vmem:[%s3751_s10 + $0x38] sm:$0xff]   ;;  %v3012_v26 = vld [vmem:[%s3753_s12] sm:$0xff]  }
 0x48a   :  { %v1724_v44 = vpop.permute.xlu1 %1723 }
 0x48c   :  { %v2947_v27 = vpop.permute.xlu0 %2946 }
 0x48d   :  { %v2949_v28 = vunpack.i.h.bf16 %v2947_v27  ;;  %v2948_v38 = vunpack.i.l.bf16 %v2947_v27  ;;  %v3013_v27 = vld [vmem:[%s3753_s12 + $0x8] sm:$0xff]  }
 0x48e   :  { %v2952_v63 = vpop.permute.xlu1 %2951 }
 0x48f   :  { %v1808_v29 = vld [vmem:[#allocation2 + $0x1] sm:$0x1]  ;;  %v1720_v31 = vld [vmem:[#allocation2] sm:$0x1]  ;;  %v2954_v0 = vunpack.i.h.bf16 %v2952_v63  ;;  %v2953_v61 = vunpack.i.l.bf16 %v2952_v63  ;;  %v3018_v63 = vld [vmem:[%s3753_s12 + $0x30] sm:$0xff]  }
 0x490   :  { %v1809_v42 = vsel %vm1719_vm14, %v2949_v28, %v1808_v29  ;;  %v1721_v43 = vsel %vm1719_vm14, %v2948_v38, %v1720_v31  ;;  %v1812_v45 = vpop.permute.xlu0 %1811  ;;  %v3014_v28 = vld [vmem:[%s3753_s12 + $0x10] sm:$0xff]   ;;  %v3015_v38 = vld [vmem:[%s3753_s12 + $0x18] sm:$0xff]   ;;  %v3016_v29 = vld [vmem:[%s3753_s12 + $0x20] sm:$0xff]  }
 0x491   :  { %1722 = vst [vmem:[#allocation2] sm:$0x1] %v1721_v43  ;;  %1810 = vst [vmem:[#allocation2 + $0x1] sm:$0x1] %v1809_v42  ;;  %v3017_v31 = vld [vmem:[%s3753_s12 + $0x28] sm:$0xff]  }
 0x492   :  { %v1828_v49 = vpop.permute.xlu1 %1827  ;;  %v2498_v42 = vld [vmem:[%s3750_s9] ss:$0 sm:$0xff] }
 0x494   :  { %v1742_v7 = vpop.permute.xlu0 %1741 }
 0x496   :  { %v1760_v13 = vpop.permute.xlu1 %1759 }
 0x498   :  { %v1727_v54 = vld [vmem:[#allocation2] sm:$0x1]  ;;  %v1814_v46 = vld [vmem:[#allocation2 + $0x1] sm:$0x1]  ;;  %v2957_v36 = vpop.permute.xlu0 %2956 }
 0x499   :  { %v1728_v25 = vsel %vm1726_vm9, %v1724_v44, %v1727_v54  ;;  %v1815_v47 = vsel %vm1726_vm9, %v1812_v45, %v1814_v46  ;;  %v2959_v37 = vunpack.i.h.bf16 %v2957_v36  ;;  %v2958_v50 = vunpack.i.l.bf16 %v2957_v36 }
 0x49a   :  { %1729 = vst [vmem:[#allocation2] sm:$0x1] %v1728_v25  ;;  %1816 = vst [vmem:[#allocation2 + $0x1] sm:$0x1] %v1815_v47 }
 0x49c   :  { %v1844_v51 = vpop.permute.xlu0 %1843 }
 0x4a1   :  { %v1738_v6 = vld [vmem:[#allocation2] sm:$0x1]  ;;  %v1824_v17 = vld [vmem:[#allocation2 + $0x1] sm:$0x1] }
 0x4a2   :  { %v1739_v18 = vsel %vm1737_vm11, %v2953_v61, %v1738_v6  ;;  %v1825_v32 = vsel %vm1737_vm11, %v2954_v0, %v1824_v17  ;;  %v3019_v0 = vld [vmem:[%s3753_s12 + $0x38] sm:$0xff]   ;;  %v2507_v61 = vld [vmem:[%s3752_s11] ss:$0 sm:$0xff]  ;;  %s3020_s11 = scalar_lea.vmem %s2397_s6, 32 }
 0x4a3   :  { %1740 = vst [vmem:[#allocation2] sm:$0x1] %v1739_v18  ;;  %1826 = vst [vmem:[#allocation2 + $0x1] sm:$0x1] %v1825_v32  ;;  %p3021_p0 = scmp.ne.s32.totalorder %s2397_s6, %s3020_s11  ;;  %p3026_p2 = scmp.lt.s32.totalorder %s3020_s11, %s3020_s11 }
 0x4a5   :  { %p3027_p3 = por %p3026_p2, %p3025_p1 }
 0x4a7   :  { %p3028_p4 = pnand %p3027_p3, %p3021_p0 }
 0x4aa   :  { %v1830_v33 = vld [vmem:[#allocation2 + $0x1] sm:$0x1]  ;;  %v1745_v34 = vld [vmem:[#allocation2] sm:$0x1] }
 0x4ab   :  { %v1831_v35 = vsel %vm1744_vm13, %v1828_v49, %v1830_v33  ;;  %v1746_v20 = vsel %vm1744_vm13, %v1742_v7, %v1745_v34 }
 0x4ac   :  { %1832 = vst [vmem:[#allocation2 + $0x1] sm:$0x1] %v1831_v35  ;;  %1747 = vst [vmem:[#allocation2] sm:$0x1] %v1746_v20 }
 0x4b3   :  { %v1756_v39 = vld [vmem:[#allocation2] sm:$0x1]  ;;  %v1840_v19 = vld [vmem:[#allocation2 + $0x1] sm:$0x1] }
 0x4b4   :  { %v1757_v40 = vsel %vm1755_vm15, %v2958_v50, %v1756_v39  ;;  %v1841_v41 = vsel %vm1755_vm15, %v2959_v37, %v1840_v19 }
 0x4b5   :  { %1758 = vst [vmem:[#allocation2] sm:$0x1] %v1757_v40  ;;  %1842 = vst [vmem:[#allocation2 + $0x1] sm:$0x1] %v1841_v41 }
 0x4bc   :  { %v1763_v52 = vld [vmem:[#allocation2] sm:$0x1]  ;;  %v1846_v53 = vld [vmem:[#allocation2 + $0x1] sm:$0x1] }
 0x4bd   :  { %v1764_v55 = vsel %vm1762_vm0, %v1760_v13, %v1763_v52  ;;  %v1847_v56 = vsel %vm1762_vm0, %v1844_v51, %v1846_v53 }
 0x4be   :  { %1765 = vst [vmem:[#allocation2] sm:$0x1] %v1764_v55  ;;  %1848 = vst [vmem:[#allocation2 + $0x1] sm:$0x1] %v1847_v56 }
 0x4c5   :  { %v2481_v57 = vld.sshfl [vmem:[#allocation2] sm:$0x11 pattern:$0x75316420] }
 0x4c6   :  { %v1897_v58 = vcombine.high %v2481_v57, %v2481_v57  ;;  %v1904_v60 = vrot.slane %v2481_v57, %v3444_v48 }
 0x4c8   :  { %v1911_v59 = vrot.slane %v1897_v58, %v3444_v48  ;;  %v3004_v48 = vld [vmem:[%s3751_s10] sm:$0xff]  }
 0x4ca   :  { %2042 = vmatprep.mubr.bf16.mxu0 %v1911_v59 }
 0x4cb   :  { %2043 = vmatmul.mubr.bf16.vlgmr.msra.gmra.mrb[84].mxu0 %v1904_v60 }
 0x4cc   :  { %2901 = vmatprep.mubr.msk.bf16.mxu0 %vm3045_vm2, %v3044_v8  ;;  %2886 = vmatpush3.bf16.msra.mxu0 %v3004_v48 }
 0x4cd   :  { %2887 = vmatprep.subr.bf16.mxu0 %v3044_v8 }
 0x4d0   :  { %2888 = vmatpush3.bf16.msra.mxu0 %v3005_v2 }
 0x4d1   :  { %2889 = vmatprep.subr.bf16.mxu0 %v3044_v8 }
 0x4d4   :  { %2890 = vmatpush3.bf16.msra.mxu0 %v3006_v3 }
 0x4d5   :  { %2891 = vmatprep.subr.bf16.mxu0 %v3044_v8 }
 0x4d8   :  { %2892 = vmatpush3.bf16.msra.mxu0 %v3007_v4 }
 0x4d9   :  { %2893 = vmatprep.subr.bf16.mxu0 %v3044_v8 }
 0x4dc   :  { %2894 = vmatpush3.bf16.msra.mxu0 %v3008_v5 }
 0x4dd   :  { %2895 = vmatprep.subr.bf16.mxu0 %v3044_v8 }
 0x4e0   :  { %2896 = vmatpush3.bf16.msra.mxu0 %v3009_v9 }
 0x4e1   :  { %2897 = vmatprep.subr.bf16.mxu0 %v3044_v8 }
 0x4e4   :  { %2898 = vmatpush3.bf16.msra.mxu0 %v3010_v23 }
 0x4e5   :  { %2899 = vmatprep.subr.bf16.mxu0 %v3044_v8 }
 0x4e8   :  { %2900 = vmatpush3.bf16.msra.mxu0 %v3011_v24 }
 0x59e   :  { %v2614_v10 = vpop.f32.mrb[84].mxu0 }
 0x59f   :  { %v2615_v12 = vpop.f32.mrb[85].mxu0 }
 0x5a0   :  { %v2616_v14 = vadd.f32 %v2615_v12, %v2614_v10  ;;  %v2617_v15 = vpop.f32.mrb[86].mxu0 }
 0x5a1   :  { %v2618_v30 = vpop.f32.mrb[87].mxu0 }
 0x5a2   :  { %v2045_v16 = vadd.f32 %v2616_v14, %v2480_v11 }
 0x5a4   :  { %v2050_v21 = vmax.f32 %v2045_v16, 0.0 }
 0x5a6   :  { %v2051_v22 = vpack.c.bf16 %v2050_v21, %v2050_v21 }
 0x5a8   :  { %2882 = vmatmul.mubr.bf16.vlgmr.msra.gmra.mrb[76].mxu1 %v2051_v22 }
 0x5a9   :  { %2921 = vmatprep.mubr.msk.bf16.mxu1 %vm3045_vm2, %v3044_v8  ;;  %2906 = vmatpush3.bf16.msra.mxu1 %v3012_v26 }
 0x5aa   :  { %2907 = vmatprep.subr.bf16.mxu1 %v3044_v8 }
 0x5ad   :  { %2908 = vmatpush3.bf16.msra.mxu1 %v3013_v27 }
 0x5ae   :  { %2909 = vmatprep.subr.bf16.mxu1 %v3044_v8 }
 0x5b1   :  { %2910 = vmatpush3.bf16.msra.mxu1 %v3014_v28 }
 0x5b2   :  { %2911 = vmatprep.subr.bf16.mxu1 %v3044_v8 }
 0x5b5   :  { %2912 = vmatpush3.bf16.msra.mxu1 %v3015_v38 }
 0x5b6   :  { %2913 = vmatprep.subr.bf16.mxu1 %v3044_v8 }
 0x5b9   :  { %2914 = vmatpush3.bf16.msra.mxu1 %v3016_v29 }
 0x5ba   :  { %2915 = vmatprep.subr.bf16.mxu1 %v3044_v8 }
 0x5bd   :  { %2916 = vmatpush3.bf16.msra.mxu1 %v3017_v31 }
 0x5be   :  { %2917 = vmatprep.subr.bf16.mxu1 %v3044_v8 }
 0x5c1   :  { %2918 = vmatpush3.bf16.msra.mxu1 %v3018_v63 }
 0x5c2   :  { %2919 = vmatprep.subr.bf16.mxu1 %v3044_v8  ;;  %v2516_v8 = vld [vmem:[%s3754_s13] ss:$0 sm:$0xff] }
 0x5c5   :  { %2920 = vmatpush3.bf16.msra.mxu1 %v3019_v0 }
 0x67b   :  { %v2157_v43 = vpop.f32.mrb[76].mxu1 }
 0x67c   :  { %v2158_v44 = vadd.f32 %v2498_v42, %v2157_v43  ;;  %v2883_v45 = vpop.f32.mrb[77].mxu1 }
 0x67d   :  { %v2160_v54 = vpop.f32.mrb[78].mxu1 }
 0x67e   :  { %v2163_v46 = vmax.f32 %v2158_v44, 0.0  ;;  %v2884_v25 = vpop.f32.mrb[79].mxu1 }
 0x680   :  { %v2164_v47 = vpack.c.bf16 %v2163_v46, %v2163_v46 }
 0x682   :  { %2902 = vmatmul.mubr.bf16.vlgmr.msra.gmra.mrb[88].mxu0 %v2164_v47 }
 0x755   :  { %v2270_v6 = vpop.f32.mrb[88].mxu0 }
 0x756   :  { %v2271_v17 = vadd.f32 %v2507_v61, %v2270_v6  ;;  %v2903_v18 = vpop.f32.mrb[89].mxu0 }
 0x757   :  { %v2273_v32 = vpop.f32.mrb[90].mxu0 }
 0x758   :  { %v2276_v7 = vmax.f32 %v2271_v17, 0.0  ;;  %v2904_v49 = vpop.f32.mrb[91].mxu0 }
 0x75a   :  { %v2277_v33 = vpack.c.bf16 %v2276_v7, %v2276_v7 }
 0x75c   :  { %2922 = vmatmul.mubr.bf16.vlgmr.msra.gmra.mrb[80].mxu1 %v2277_v33 }
 0x82f   :  { %v2383_v34 = vpop.f32.mrb[80].mxu1 }
 0x830   :  { %v2384_v35 = vadd.f32 %v2516_v8, %v2383_v34  ;;  %v2923_v20 = vpop.f32.mrb[81].mxu1 }
 0x831   :  { %v2386_v36 = vpop.f32.mrb[82].mxu1 }
 0x832   :  { %2389 = vst [vmem:[#allocation3] sm:$0x3] %v2384_v35  ;;  %v2924_v37 = vpop.f32.mrb[83].mxu1 }
 0x833   :  { %3031 = shalt.err (!%p3028_p4)
}
 0x834   :  { %s3032_s13 = scalar_lea.hbm %s3755_s14, 32 }
 0x835   :  { %p3033_p5 = scmp.ne.s32.totalorder %s3755_s14, %s3032_s13  ;;  %p3036_p6 = scmp.lt.u32.totalorder %s3032_s13, %s3755_s14 }
 0x837   :  { %p3038_p7 = pnand %p3036_p6, %p3033_p5 }
 0x839   :  { %3041 = shalt.err (!%p3038_p7)
}
 0x83a   :  { %2399 = dma.vmem_to_hbm [thread:$0]  %s2397_s6, 32, %s3755_s14, [#allocation4]  }
 0x83b   :  { %3042 = dma.done.wait [#allocation4], 32  }
 0x83c   :  { %3043 = vsyncadd [#allocation4], 4294967264 }
 0x83d   :  { %2403 = vsyncpa [#allocation4], 1 }

</bundles_post_ra>
